<compile_context>
chip_gen: v6e
topology: v6e:2x2x1
jax: 0.10.0
libtpu: 0.0.40
codegen_flags: <defaults>
</compile_context>

<pallas_src>
import jax
import jax.numpy as jnp
from jax.experimental import pallas as pl
from jax.experimental.pallas import tpu as pltpu


def _selection_categorical_kernel(x_ref, w1_ref, w23_ref, w4_ref, b_ref, o_ref):
    H = w1_ref.shape[1]   # n_hidden   (static)
    C = w4_ref.shape[1]   # padded class count (lane-dense, static)

    x = x_ref[...]

    # Layer 1: Linear + ReLU
    h = jnp.dot(x, w1_ref[...], preferred_element_type=jnp.float32)
    h = jnp.maximum(h + b_ref[0:1, :H], 0.0)

    # Layer 2: Linear + ReLU
    h = jnp.dot(h, w23_ref[0], preferred_element_type=jnp.float32)
    h = jnp.maximum(h + b_ref[1:2, :H], 0.0)

    # Layer 3: Linear + ReLU
    h = jnp.dot(h, w23_ref[1], preferred_element_type=jnp.float32)
    h = jnp.maximum(h + b_ref[2:3, :H], 0.0)

    # Layer 4: Linear (output padded to C=128 lanes; padded bias = -1e30 so the
    # padded logits vanish under softmax without producing NaN).
    logits = jnp.dot(h, w4_ref[...], preferred_element_type=jnp.float32)
    logits = logits + b_ref[3:4, :C]

    # Numerically-stable softmax over the (lane-dense) last axis, exact division.
    m = jnp.max(logits, axis=-1, keepdims=True)
    e = jnp.exp(logits - m)
    denom = jnp.sum(e, axis=-1, keepdims=True)
    o_ref[...] = (e / denom).astype(o_ref.dtype)


def _round_up(n, m):
    return ((n + m - 1) // m) * m


def prepare_params(params, *, lane=128):
    """One-time packing/padding of nn.Linear params into kernel-friendly arrays.

    params: dict w1..w4 of shape (in, out), b1..b4 of shape (1, out), float32.
    """
    f32 = jnp.float32
    w1 = params["w1"].astype(f32)                              # (state, H)
    H = w1.shape[1]
    n_classes = params["w4"].shape[1]
    c_pad = _round_up(max(n_classes, lane), lane)              # lane-dense logits

    w23 = jnp.stack([params["w2"], params["w3"]]).astype(f32)  # (2, H, H)
    w4 = jnp.zeros((H, c_pad), f32).at[:, :n_classes].set(params["w4"].astype(f32))

    bias_w = _round_up(max(H, c_pad), lane)
    b_all = jnp.zeros((4, bias_w), f32)
    b_all = b_all.at[0, :H].set(params["b1"].astype(f32).reshape(-1))
    b_all = b_all.at[1, :H].set(params["b2"].astype(f32).reshape(-1))
    b_all = b_all.at[2, :H].set(params["b3"].astype(f32).reshape(-1))
    b_all = b_all.at[3, :].set(-1e30)   # finite large negative, NOT -inf
    b_all = b_all.at[3, :n_classes].set(params["b4"].astype(f32).reshape(-1))

    return {"w1": w1, "w23": w23, "w4": w4, "b": b_all,
            "n_hidden": H, "n_classes": n_classes, "c_pad": c_pad}


def selection_categorical_forward(x, prepared, *, tile_b=None):
    """Fused MLP + softmax.

    x: (B, state_shape) float32
    prepared: output of prepare_params
    returns: (B, n_classes) float32 probabilities (rows sum to ~1)
    """
    B, state = x.shape
    H = prepared["n_hidden"]
    n_classes = prepared["n_classes"]
    c_pad = prepared["c_pad"]

    padded_b = _round_up(B, 8)
    if tile_b is None:
        tile_b = min(padded_b, 4096)          # few fat steps, not many tiny ones
    tile_b = _round_up(min(tile_b, padded_b), 8)
    grid_b = pl.cdiv(padded_b, tile_b)
    padded_b = grid_b * tile_b

    x = x.astype(jnp.float32)
    if padded_b != B:                         # no-op when B divides cleanly
        x = jnp.pad(x, ((0, padded_b - B), (0, 0)))

    def resident(arr):
        nd = arr.ndim
        return pl.BlockSpec(arr.shape, lambda i, _nd=nd: (0,) * _nd)

    in_specs = [
        pl.BlockSpec((tile_b, state), lambda i: (i, 0)),
        resident(prepared["w1"]),
        resident(prepared["w23"]),
        resident(prepared["w4"]),
        resident(prepared["b"]),
    ]
    out_spec = pl.BlockSpec((tile_b, c_pad), lambda i: (i, 0))

    weight_bytes = 4 * (prepared["w1"].size + prepared["w23"].size
                        + prepared["w4"].size + prepared["b"].size)
    cost = pl.CostEstimate(
        flops=2 * padded_b * (state * H + 2 * H * H + H * c_pad),
        transcendentals=padded_b * c_pad,
        bytes_accessed=4 * padded_b * (state + c_pad) + weight_bytes,
    )

    # x + out tiles double-buffered + resident weights; only raise the scoped
    # VMEM limit if a very large batch tile would exceed v5e's 16 MiB default.
    vmem_bytes = 2 * 4 * tile_b * (state + c_pad) + weight_bytes
    compiler_kwargs = dict(dimension_semantics=("parallel",))
    if vmem_bytes > 14 * 1024 * 1024:
        compiler_kwargs["vmem_limit_bytes"] = min(
            int(vmem_bytes * 3 // 2), 100 * 1024 * 1024)

    out = pl.pallas_call(
        _selection_categorical_kernel,
        out_shape=jax.ShapeDtypeStruct((padded_b, c_pad), jnp.float32),
        grid=(grid_b,),
        in_specs=in_specs,
        out_specs=out_spec,
        compiler_params=pltpu.CompilerParams(**compiler_kwargs),
        cost_estimate=cost,
    )(x, prepared["w1"], prepared["w23"], prepared["w4"], prepared["b"])

    return out[:B, :n_classes]


def init_params(key, state_shape, n_classes, n_hidden=None):
    """Deterministic synthetic init matching the module's parameter shapes."""
    if n_hidden is None:
        n_hidden = int(n_classes) * 2
    dims = [(state_shape, n_hidden), (n_hidden, n_hidden),
            (n_hidden, n_hidden), (n_hidden, n_classes)]
    params = {}
    for i, (fan_in, fan_out) in enumerate(dims, start=1):
        key, kw, kb = jax.random.split(key, 3)
        bound = 1.0 / jnp.sqrt(fan_in)
        params[f"w{i}"] = jax.random.uniform(
            kw, (fan_in, fan_out), jnp.float32, -bound, bound)
        params[f"b{i}"] = jax.random.uniform(
            kb, (1, fan_out), jnp.float32, -bound, bound)
    return params


def _reference_forward(x, params):
    """Pure-JAX f32 reference of the PyTorch forward."""
    prec = jax.lax.Precision.HIGHEST

    def dense(h, w, b):
        return jnp.dot(h, w, precision=prec) + b

    h = jnp.maximum(dense(x, params["w1"], params["b1"]), 0.0)
    h = jnp.maximum(dense(h, params["w2"], params["b2"]), 0.0)
    h = jnp.maximum(dense(h, params["w3"], params["b3"]), 0.0)
    logits = dense(h, params["w4"], params["b4"])
    return jax.nn.softmax(logits, axis=-1)


if __name__ == "__main__":
    # Module-consistent shapes: state_shape = 32, n_classes = 16
    # -> n_hidden = 2 * 16 = 32.  Batch 512 runs as a single fat grid step.
    B, STATE, N_CLASSES = 512, 32, 16

    key = jax.random.PRNGKey(0)
    key, kx = jax.random.split(key)
    x = jax.random.normal(kx, (B, STATE), jnp.float32)
    params = init_params(key, STATE, N_CLASSES)
    prepared = prepare_params(params)

    out = selection_categorical_forward(x, prepared)
    out = jax.block_until_ready(out)

    ref = _reference_forward(x, params)
    assert out.shape == (B, N_CLASSES)
    # Exact division -> rows sum to 1 within f32 rounding.
    assert jnp.allclose(jnp.sum(out, axis=-1), 1.0, atol=1e-5)
    assert jnp.allclose(out, ref, atol=5e-3, rtol=5e-3)

    print("KERNEL_OK")
</pallas_src>

<mosaic_0001>
module attributes {stable_mosaic.version = 11 : i64} {
  func.func @_selection_categorical_kernel(%arg0: i32, %arg1: memref<512x32xf32, #tpu.memory_space<vmem>>, %arg2: memref<32x32xf32, #tpu.memory_space<vmem>>, %arg3: memref<2x32x32xf32, #tpu.memory_space<vmem>>, %arg4: memref<32x128xf32, #tpu.memory_space<vmem>>, %arg5: memref<4x128xf32, #tpu.memory_space<vmem>>, %arg6: memref<512x128xf32, #tpu.memory_space<vmem>>) attributes {dimension_semantics = [#tpu.dimension_semantics<parallel>], iteration_bounds = array<i64: 1>, scalar_prefetch = 0 : i64, scratch_operands = 0 : i64, tpu.core_type = #tpu.core_type<tc>, window_params = [{transform_indices = @transform_0, window_bounds = array<i64: 512, 32>}, {pipeline_mode = #tpu.pipeline_mode<synchronous>, transform_indices = @transform_1, window_bounds = array<i64: 32, 32>}, {pipeline_mode = #tpu.pipeline_mode<synchronous>, transform_indices = @transform_2, window_bounds = array<i64: 2, 32, 32>}, {pipeline_mode = #tpu.pipeline_mode<synchronous>, transform_indices = @transform_3, window_bounds = array<i64: 32, 128>}, {pipeline_mode = #tpu.pipeline_mode<synchronous>, transform_indices = @transform_4, window_bounds = array<i64: 4, 128>}, {transform_indices = @transform_5, window_bounds = array<i64: 512, 128>}]} {
    %c0 = arith.constant 0 : index
    %c0_0 = arith.constant 0 : index
    %0 = vector.load %arg1[%c0, %c0_0] : memref<512x32xf32, #tpu.memory_space<vmem>>, vector<512x32xf32>
    %c0_1 = arith.constant 0 : index
    %c0_2 = arith.constant 0 : index
    %1 = vector.load %arg2[%c0_1, %c0_2] : memref<32x32xf32, #tpu.memory_space<vmem>>, vector<32x32xf32>
    %cst = arith.constant dense<0.000000e+00> : vector<512x32xf32>
    %2 = tpu.matmul %0, %1, %cst {dimension_numbers = #tpu.dot_dimension_numbers<[1], [0], [0], [1], [0, 0, 1, 1], [], []>} : vector<512x32xf32>, vector<32x32xf32>, vector<512x32xf32> -> vector<512x32xf32>
    %c0_3 = arith.constant 0 : index
    %c0_4 = arith.constant 0 : index
    %3 = vector.load %arg5[%c0_3, %c0_4] : memref<4x128xf32, #tpu.memory_space<vmem>>, vector<1x32xf32>
    %4 = vector.broadcast %3 : vector<1x32xf32> to vector<512x32xf32>
    %5 = arith.addf %2, %4 : vector<512x32xf32>
    %cst_5 = arith.constant 0.000000e+00 : f32
    %6 = vector.broadcast %cst_5 : f32 to vector<512x32xf32>
    %7 = arith.maximumf %5, %6 : vector<512x32xf32>
    %c0_6 = arith.constant 0 : index
    %c0_7 = arith.constant 0 : index
    %c0_8 = arith.constant 0 : index
    %8 = vector.load %arg3[%c0_6, %c0_7, %c0_8] : memref<2x32x32xf32, #tpu.memory_space<vmem>>, vector<1x32x32xf32>
    %9 = vector.shape_cast %8 : vector<1x32x32xf32> to vector<32x32xf32>
    %cst_9 = arith.constant dense<0.000000e+00> : vector<512x32xf32>
    %10 = tpu.matmul %7, %9, %cst_9 {dimension_numbers = #tpu.dot_dimension_numbers<[1], [0], [0], [1], [0, 0, 1, 1], [], []>} : vector<512x32xf32>, vector<32x32xf32>, vector<512x32xf32> -> vector<512x32xf32>
    %c1 = arith.constant 1 : index
    %c0_10 = arith.constant 0 : index
    %11 = vector.load %arg5[%c1, %c0_10] : memref<4x128xf32, #tpu.memory_space<vmem>>, vector<1x32xf32>
    %12 = vector.broadcast %11 : vector<1x32xf32> to vector<512x32xf32>
    %13 = arith.addf %10, %12 : vector<512x32xf32>
    %cst_11 = arith.constant 0.000000e+00 : f32
    %14 = vector.broadcast %cst_11 : f32 to vector<512x32xf32>
    %15 = arith.maximumf %13, %14 : vector<512x32xf32>
    %c1_12 = arith.constant 1 : index
    %c0_13 = arith.constant 0 : index
    %c0_14 = arith.constant 0 : index
    %16 = vector.load %arg3[%c1_12, %c0_13, %c0_14] : memref<2x32x32xf32, #tpu.memory_space<vmem>>, vector<1x32x32xf32>
    %17 = vector.shape_cast %16 : vector<1x32x32xf32> to vector<32x32xf32>
    %cst_15 = arith.constant dense<0.000000e+00> : vector<512x32xf32>
    %18 = tpu.matmul %15, %17, %cst_15 {dimension_numbers = #tpu.dot_dimension_numbers<[1], [0], [0], [1], [0, 0, 1, 1], [], []>} : vector<512x32xf32>, vector<32x32xf32>, vector<512x32xf32> -> vector<512x32xf32>
    %c2 = arith.constant 2 : index
    %c0_16 = arith.constant 0 : index
    %19 = vector.load %arg5[%c2, %c0_16] : memref<4x128xf32, #tpu.memory_space<vmem>>, vector<1x32xf32>
    %20 = vector.broadcast %19 : vector<1x32xf32> to vector<512x32xf32>
    %21 = arith.addf %18, %20 : vector<512x32xf32>
    %cst_17 = arith.constant 0.000000e+00 : f32
    %22 = vector.broadcast %cst_17 : f32 to vector<512x32xf32>
    %23 = arith.maximumf %21, %22 : vector<512x32xf32>
    %c0_18 = arith.constant 0 : index
    %c0_19 = arith.constant 0 : index
    %24 = vector.load %arg4[%c0_18, %c0_19] : memref<32x128xf32, #tpu.memory_space<vmem>>, vector<32x128xf32>
    %cst_20 = arith.constant dense<0.000000e+00> : vector<512x128xf32>
    %25 = tpu.matmul %23, %24, %cst_20 {dimension_numbers = #tpu.dot_dimension_numbers<[1], [0], [0], [1], [0, 0, 1, 1], [], []>} : vector<512x32xf32>, vector<32x128xf32>, vector<512x128xf32> -> vector<512x128xf32>
    %c3 = arith.constant 3 : index
    %c0_21 = arith.constant 0 : index
    %26 = vector.load %arg5[%c3, %c0_21] : memref<4x128xf32, #tpu.memory_space<vmem>>, vector<1x128xf32>
    %27 = vector.broadcast %26 : vector<1x128xf32> to vector<512x128xf32>
    %28 = arith.addf %25, %27 : vector<512x128xf32>
    %cst_22 = arith.constant dense<0xFF800000> : vector<512xf32>
    %29 = vector.multi_reduction <maximumf>, %28, %cst_22 [1] : vector<512x128xf32> to vector<512xf32>
    %30 = vector.shape_cast %29 : vector<512xf32> to vector<512x1xf32>
    %31 = vector.broadcast %30 : vector<512x1xf32> to vector<512x128xf32>
    %32 = arith.subf %28, %31 : vector<512x128xf32>
    %33 = math.exp %32 : vector<512x128xf32>
    %cst_23 = arith.constant dense<0.000000e+00> : vector<512xf32>
    %34 = vector.multi_reduction <add>, %33, %cst_23 [1] : vector<512x128xf32> to vector<512xf32>
    %35 = vector.shape_cast %34 : vector<512xf32> to vector<512x1xf32>
    %36 = vector.broadcast %35 : vector<512x1xf32> to vector<512x128xf32>
    %37 = arith.divf %33, %36 : vector<512x128xf32>
    %c0_24 = arith.constant 0 : index
    %c0_25 = arith.constant 0 : index
    %38 = vector.load %arg6[%c0_24, %c0_25] : memref<512x128xf32, #tpu.memory_space<vmem>>, vector<512x128xf32>
    tpu.vector_store %arg6[%c0_24, %c0_25], %37 {strides = array<i32>} : memref<512x128xf32, #tpu.memory_space<vmem>>, vector<512x128xf32>,
    return
  }
  func.func @transform_0(%arg0: i32) -> (i32, i32) {
    %c0_i32 = arith.constant 0 : i32
    %c0_i32_0 = arith.constant 0 : i32
    return %arg0, %c0_i32 : i32, i32
  }
  func.func @transform_1(%arg0: i32) -> (i32, i32) {
    %c0_i32 = arith.constant 0 : i32
    %c0_i32_0 = arith.constant 0 : i32
    %c0_i32_1 = arith.constant 0 : i32
    return %c0_i32, %c0_i32_0 : i32, i32
  }
  func.func @transform_2(%arg0: i32) -> (i32, i32, i32) {
    %c0_i32 = arith.constant 0 : i32
    %c0_i32_0 = arith.constant 0 : i32
    %c0_i32_1 = arith.constant 0 : i32
    %c0_i32_2 = arith.constant 0 : i32
    return %c0_i32, %c0_i32_0, %c0_i32_1 : i32, i32, i32
  }
  func.func @transform_3(%arg0: i32) -> (i32, i32) {
    %c0_i32 = arith.constant 0 : i32
    %c0_i32_0 = arith.constant 0 : i32
    %c0_i32_1 = arith.constant 0 : i32
    return %c0_i32, %c0_i32_0 : i32, i32
  }
  func.func @transform_4(%arg0: i32) -> (i32, i32) {
    %c0_i32 = arith.constant 0 : i32
    %c0_i32_0 = arith.constant 0 : i32
    %c0_i32_1 = arith.constant 0 : i32
    return %c0_i32, %c0_i32_0 : i32, i32
  }
  func.func @transform_5(%arg0: i32) -> (i32, i32) {
    %c0_i32 = arith.constant 0 : i32
    %c0_i32_0 = arith.constant 0 : i32
    return %arg0, %c0_i32 : i32, i32
  }
}

</mosaic_0001>

<bundles_post_ra>
// kernel: tpu_custom_call.1
= control target key start
LH: loop header
LB: loop body
LE: loop exit
PB: predicated region body
PF: predicated region fallthrough
CT: control target
= control target key end

     0   :  { %vm94_vm0 = vcmask 261120   ;;  %s5832_s0 = inlined_call_operand.vmem [shape: f32[512,32], index: 0, kind: input, shape index: {}]   ;;  %s5833_s1 = inlined_call_operand.vmem [shape: f32[32,32], index: 1, kind: input, shape index: {}]   ;;  %s5834_s2 = inlined_call_operand.vmem [shape: f32[2,32,32], index: 2, kind: input, shape index: {}]   ;;  %s5835_s3 = inlined_call_operand.vmem [shape: f32[32,128], index: 3, kind: input, shape index: {}]   ;;  %s5836_s4 = inlined_call_operand.vmem [shape: f32[4,128], index: 4, kind: input, shape index: {}]   ;;  %s5837_s5 = inlined_call_operand.hbm [shape: f32[512,128], index: 5, kind: output, shape index: {}]  }
   0x1   :  { %v88_v0 = vld [vmem:[%s5833_s1 + $0x18] sm:$0xff]  ;;  %v87_v1 = vld [vmem:[%s5833_s1 + $0x10] sm:$0xff]  ;;  %v21_v2 = vld [vmem:[%s5832_s0] sm:$0xff] }
   0x2   :  { %3815 = vmatprep.subr.mxu0 %v88_v0  ;;  %v86_v3 = vld [vmem:[%s5833_s1 + $0x8] sm:$0xff]  ;;  %3823 = vmatprep.mubr.msk.f32.mxu0 %vm94_vm0, %v21_v2  ;;  %v85_v4 = vld [vmem:[%s5833_s1] sm:$0xff]  ;;  %v23_v6 = vld [vmem:[%s5832_s0 + $0x10] sm:$0xff] }
   0x3   :  { %3816 = vmatpush3.msra.mxu0 %v88_v0  ;;  %v22_v5 = vld [vmem:[%s5832_s0 + $0x8] sm:$0xff]  ;;  %v24_v7 = vld [vmem:[%s5832_s0 + $0x18] sm:$0xff]  ;;  %v25_v8 = vld [vmem:[%s5832_s0 + $0x20] sm:$0xff] }
   0x4   :  { %3817 = vmatprep.subr.mxu0 %v87_v1  ;;  %v26_v9 = vld [vmem:[%s5832_s0 + $0x28] sm:$0xff]  ;;  %v27_v10 = vld [vmem:[%s5832_s0 + $0x30] sm:$0xff]  ;;  %v28_v11 = vld [vmem:[%s5832_s0 + $0x38] sm:$0xff] }
   0x5   :  { %3818 = vmatpush3.msra.mxu0 %v87_v1  ;;  %v29_v12 = vld [vmem:[%s5832_s0 + $0x40] sm:$0xff]  ;;  %v30_v13 = vld [vmem:[%s5832_s0 + $0x48] sm:$0xff] }
   0x6   :  { %3819 = vmatprep.subr.mxu0 %v86_v3 }
   0x7   :  { %3820 = vmatpush3.msra.mxu0 %v86_v3 }
   0x8   :  { %3821 = vmatprep.subr.mxu0 %v85_v4 }
   0x9   :  { %3822 = vmatpush3.msra.mxu0 %v85_v4 }
   0xa   :  { %3824 = vmatmul.mubr.msk.f32.vlgmr.msra.gmra.mxu0 %vm94_vm0, %v22_v5 }
   0xb   :  { %3826 = vmatprep.mubr.msk.f32.mxu0 %vm94_vm0, %v23_v6 }
   0xe   :  { %3827 = vmatmul.mubr.msk.f32.gmra.mxu0 %vm94_vm0, %v24_v7 }
   0xf   :  { %3829 = vmatprep.mubr.msk.f32.mxu0 %vm94_vm0, %v25_v8 }
  0x12   :  { %3830 = vmatmul.mubr.msk.f32.gmra.mxu0 %vm94_vm0, %v26_v9 }
  0x13   :  { %3832 = vmatprep.mubr.msk.f32.mxu0 %vm94_vm0, %v27_v10 }
  0x16   :  { %3833 = vmatmul.mubr.msk.f32.gmra.mxu0 %vm94_vm0, %v28_v11 }
  0x17   :  { %3835 = vmatprep.mubr.msk.f32.mxu0 %vm94_vm0, %v29_v12 }
  0x18   :  { %10 = vsyncpa [#allocation3], 0  ;;  %v31_v14 = vld [vmem:[%s5832_s0 + $0x50] sm:$0xff]  ;;  %v32_v15 = vld [vmem:[%s5832_s0 + $0x58] sm:$0xff] }
  0x19   :  { %v33_v16 = vld [vmem:[%s5832_s0 + $0x60] sm:$0xff]  ;;  %v34_v17 = vld [vmem:[%s5832_s0 + $0x68] sm:$0xff]  ;;  %v35_v18 = vld [vmem:[%s5832_s0 + $0x70] sm:$0xff] }
  0x1a   :  { %3836 = vmatmul.mubr.msk.f32.gmra.mxu0 %vm94_vm0, %v30_v13  ;;  %v36_v19 = vld [vmem:[%s5832_s0 + $0x78] sm:$0xff]  ;;  %v37_v20 = vld [vmem:[%s5832_s0 + $0x80] sm:$0xff]  ;;  %v38_v21 = vld [vmem:[%s5832_s0 + $0x88] sm:$0xff] }
  0x1b   :  { %3838 = vmatprep.mubr.msk.f32.mxu0 %vm94_vm0, %v31_v14  ;;  %v39_v22 = vld [vmem:[%s5832_s0 + $0x90] sm:$0xff]  ;;  %v40_v23 = vld [vmem:[%s5832_s0 + $0x98] sm:$0xff]  ;;  %v41_v24 = vld [vmem:[%s5832_s0 + $0xa0] sm:$0xff] }
  0x1c   :  { %v42_v25 = vld [vmem:[%s5832_s0 + $0xa8] sm:$0xff]  ;;  %v43_v26 = vld [vmem:[%s5832_s0 + $0xb0] sm:$0xff]  ;;  %v44_v27 = vld [vmem:[%s5832_s0 + $0xb8] sm:$0xff] }
  0x1d   :  { %v45_v28 = vld [vmem:[%s5832_s0 + $0xc0] sm:$0xff]  ;;  %v46_v29 = vld [vmem:[%s5832_s0 + $0xc8] sm:$0xff]  ;;  %v47_v30 = vld [vmem:[%s5832_s0 + $0xd0] sm:$0xff] }
  0x1e   :  { %3839 = vmatmul.mubr.msk.f32.gmra.mxu0 %vm94_vm0, %v32_v15  ;;  %v48_v31 = vld [vmem:[%s5832_s0 + $0xd8] sm:$0xff]  ;;  %v49_v32 = vld [vmem:[%s5832_s0 + $0xe0] sm:$0xff]  ;;  %v50_v33 = vld [vmem:[%s5832_s0 + $0xe8] sm:$0xff] }
  0x1f   :  { %3841 = vmatprep.mubr.msk.f32.mxu0 %vm94_vm0, %v33_v16  ;;  %v51_v34 = vld [vmem:[%s5832_s0 + $0xf0] sm:$0xff]  ;;  %v52_v35 = vld [vmem:[%s5832_s0 + $0xf8] sm:$0xff]  ;;  %v53_v36 = vld [vmem:[%s5832_s0 + $0x100] sm:$0xff] }
  0x20   :  { %v54_v37 = vld [vmem:[%s5832_s0 + $0x108] sm:$0xff]  ;;  %v55_v38 = vld [vmem:[%s5832_s0 + $0x110] sm:$0xff]  ;;  %v739_v39 = vld [vmem:[%s5834_s2 + $0x18] sm:$0xff] }
  0x21   :  { %3919 = vmatprep.subr.mxu1 %v739_v39  ;;  %v56_v40 = vld [vmem:[%s5832_s0 + $0x118] sm:$0xff]  ;;  %v738_v41 = vld [vmem:[%s5834_s2 + $0x10] sm:$0xff]  ;;  %v57_v42 = vld [vmem:[%s5832_s0 + $0x120] sm:$0xff] }
  0x22   :  { %3842 = vmatmul.mubr.msk.f32.gmra.mxu0 %vm94_vm0, %v34_v17  ;;  %3920 = vmatpush3.msra.mxu1 %v739_v39  ;;  %v737_v43 = vld [vmem:[%s5834_s2 + $0x8] sm:$0xff]  ;;  %v736_v45 = vld [vmem:[%s5834_s2] sm:$0xff]  ;;  %v59_v46 = vld [vmem:[%s5832_s0 + $0x130] sm:$0xff] }
  0x23   :  { %3844 = vmatprep.mubr.msk.f32.mxu0 %vm94_vm0, %v35_v18  ;;  %3921 = vmatprep.subr.mxu1 %v738_v41  ;;  %v58_v44 = vld [vmem:[%s5832_s0 + $0x128] sm:$0xff]  ;;  %v60_v47 = vld [vmem:[%s5832_s0 + $0x138] sm:$0xff]  ;;  %v61_v48 = vld [vmem:[%s5832_s0 + $0x140] sm:$0xff] }
  0x24   :  { %3922 = vmatpush3.msra.mxu1 %v738_v41  ;;  %v62_v49 = vld [vmem:[%s5832_s0 + $0x148] sm:$0xff]  ;;  %v63_v50 = vld [vmem:[%s5832_s0 + $0x150] sm:$0xff]  ;;  %v64_v51 = vld [vmem:[%s5832_s0 + $0x158] sm:$0xff] }
  0x25   :  { %3923 = vmatprep.subr.mxu1 %v737_v43  ;;  %v65_v52 = vld [vmem:[%s5832_s0 + $0x160] sm:$0xff]  ;;  %v66_v53 = vld [vmem:[%s5832_s0 + $0x168] sm:$0xff]  ;;  %v67_v54 = vld [vmem:[%s5832_s0 + $0x170] sm:$0xff] }
  0x26   :  { %3845 = vmatmul.mubr.msk.f32.gmra.mxu0 %vm94_vm0, %v36_v19  ;;  %3924 = vmatpush3.msra.mxu1 %v737_v43  ;;  %v68_v55 = vld [vmem:[%s5832_s0 + $0x178] sm:$0xff]  ;;  %v69_v56 = vld [vmem:[%s5832_s0 + $0x180] sm:$0xff]  ;;  %v70_v57 = vld [vmem:[%s5832_s0 + $0x188] sm:$0xff] }
  0x27   :  { %3847 = vmatprep.mubr.msk.f32.mxu0 %vm94_vm0, %v37_v20  ;;  %3925 = vmatprep.subr.mxu1 %v736_v45  ;;  %v71_v58 = vld [vmem:[%s5832_s0 + $0x190] sm:$0xff]  ;;  %v72_v59 = vld [vmem:[%s5832_s0 + $0x198] sm:$0xff]  ;;  %v73_v60 = vld [vmem:[%s5832_s0 + $0x1a0] sm:$0xff] }
  0x28   :  { %3926 = vmatpush3.msra.mxu1 %v736_v45  ;;  %v74_v61 = vld [vmem:[%s5832_s0 + $0x1a8] sm:$0xff]  ;;  %v75_v62 = vld [vmem:[%s5832_s0 + $0x1b0] sm:$0xff]  ;;  %v76_v63 = vld [vmem:[%s5832_s0 + $0x1b8] sm:$0xff] }
  0x29   :  { %v77_v0 = vld [vmem:[%s5832_s0 + $0x1c0] sm:$0xff]  ;;  %v78_v1 = vld [vmem:[%s5832_s0 + $0x1c8] sm:$0xff]  ;;  %v79_v2 = vld [vmem:[%s5832_s0 + $0x1d0] sm:$0xff] }
  0x2a   :  { %3848 = vmatmul.mubr.msk.f32.gmra.mxu0 %vm94_vm0, %v38_v21  ;;  %v80_v3 = vld [vmem:[%s5832_s0 + $0x1d8] sm:$0xff]  ;;  %v81_v4 = vld [vmem:[%s5832_s0 + $0x1e0] sm:$0xff]  ;;  %v82_v5 = vld [vmem:[%s5832_s0 + $0x1e8] sm:$0xff] }
  0x2b   :  { %3850 = vmatprep.mubr.msk.f32.mxu0 %vm94_vm0, %v39_v22  ;;  %v83_v6 = vld [vmem:[%s5832_s0 + $0x1f0] sm:$0xff]  ;;  %v84_v7 = vld [vmem:[%s5832_s0 + $0x1f8] sm:$0xff]  ;;  %v4834_v10 = vld [vmem:[%s5836_s4] ss:$0 sm:$0xff] }
  0x2c   :  { %v3412_v8 = vld [vmem:[%s5834_s2 + $0x38] sm:$0xff]  ;;  %v3411_v9 = vld [vmem:[%s5834_s2 + $0x30] sm:$0xff]  ;;  %v3410_v16 = vld [vmem:[%s5834_s2 + $0x28] sm:$0xff] }
  0x2d   :  { %4023 = vmatprep.subr.mxu0 %v3412_v8  ;;  %v3409_v17 = vld [vmem:[%s5834_s2 + $0x20] sm:$0xff] }
  0x2e   :  { %3851 = vmatmul.mubr.msk.f32.gmra.mxu0 %vm94_vm0, %v40_v23 }
  0x2f   :  { %3853 = vmatprep.mubr.msk.f32.mxu0 %vm94_vm0, %v41_v24  ;;  %4024 = vmatpush3.msra.mxu0 %v3412_v8 }
  0x30   :  { %4025 = vmatprep.subr.mxu0 %v3411_v9 }
  0x31   :  { %4026 = vmatpush3.msra.mxu0 %v3411_v9 }
  0x32   :  { %3854 = vmatmul.mubr.msk.f32.gmra.mxu0 %vm94_vm0, %v42_v25  ;;  %4027 = vmatprep.subr.mxu0 %v3410_v16 }
  0x33   :  { %3856 = vmatprep.mubr.msk.f32.mxu0 %vm94_vm0, %v43_v26  ;;  %4028 = vmatpush3.msra.mxu0 %v3410_v16 }
  0x34   :  { %4029 = vmatprep.subr.mxu0 %v3409_v17 }
  0x35   :  { %4030 = vmatpush3.msra.mxu0 %v3409_v17 }
  0x36   :  { %3857 = vmatmul.mubr.msk.f32.gmra.mxu0 %vm94_vm0, %v44_v27 }
  0x37   :  { %3859 = vmatprep.mubr.msk.f32.mxu0 %vm94_vm0, %v45_v28 }
  0x3a   :  { %3860 = vmatmul.mubr.msk.f32.gmra.mxu0 %vm94_vm0, %v46_v29 }
  0x3b   :  { %3862 = vmatprep.mubr.msk.f32.mxu0 %vm94_vm0, %v47_v30 }
  0x3e   :  { %3863 = vmatmul.mubr.msk.f32.gmra.mxu0 %vm94_vm0, %v48_v31 }
  0x3f   :  { %3865 = vmatprep.mubr.msk.f32.mxu0 %vm94_vm0, %v49_v32 }
  0x42   :  { %3866 = vmatmul.mubr.msk.f32.gmra.mxu0 %vm94_vm0, %v50_v33 }
  0x43   :  { %3868 = vmatprep.mubr.msk.f32.mxu0 %vm94_vm0, %v51_v34 }
  0x46   :  { %3869 = vmatmul.mubr.msk.f32.gmra.mxu0 %vm94_vm0, %v52_v35 }
  0x47   :  { %3871 = vmatprep.mubr.msk.f32.mxu0 %vm94_vm0, %v53_v36 }
  0x4a   :  { %3872 = vmatmul.mubr.msk.f32.gmra.mxu0 %vm94_vm0, %v54_v37 }
  0x4b   :  { %3874 = vmatprep.mubr.msk.f32.mxu0 %vm94_vm0, %v55_v38 }
  0x4e   :  { %3875 = vmatmul.mubr.msk.f32.gmra.mxu0 %vm94_vm0, %v56_v40 }
  0x4f   :  { %3877 = vmatprep.mubr.msk.f32.mxu0 %vm94_vm0, %v57_v42 }
  0x52   :  { %3878 = vmatmul.mubr.msk.f32.gmra.mxu0 %vm94_vm0, %v58_v44 }
  0x53   :  { %3880 = vmatprep.mubr.msk.f32.mxu0 %vm94_vm0, %v59_v46 }
  0x56   :  { %3881 = vmatmul.mubr.msk.f32.gmra.mxu0 %vm94_vm0, %v60_v47 }
  0x57   :  { %3883 = vmatprep.mubr.msk.f32.mxu0 %vm94_vm0, %v61_v48 }
  0x5a   :  { %3884 = vmatmul.mubr.msk.f32.gmra.mxu0 %vm94_vm0, %v62_v49 }
  0x5b   :  { %3886 = vmatprep.mubr.msk.f32.mxu0 %vm94_vm0, %v63_v50 }
  0x5e   :  { %3887 = vmatmul.mubr.msk.f32.gmra.mxu0 %vm94_vm0, %v64_v51 }
  0x5f   :  { %3889 = vmatprep.mubr.msk.f32.mxu0 %vm94_vm0, %v65_v52 }
  0x62   :  { %3890 = vmatmul.mubr.msk.f32.gmra.mxu0 %vm94_vm0, %v66_v53 }
  0x63   :  { %3892 = vmatprep.mubr.msk.f32.mxu0 %vm94_vm0, %v67_v54 }
  0x66   :  { %3893 = vmatmul.mubr.msk.f32.gmra.mxu0 %vm94_vm0, %v68_v55 }
  0x67   :  { %3895 = vmatprep.mubr.msk.f32.mxu0 %vm94_vm0, %v69_v56 }
  0x6a   :  { %3896 = vmatmul.mubr.msk.f32.gmra.mxu0 %vm94_vm0, %v70_v57 }
  0x6b   :  { %3898 = vmatprep.mubr.msk.f32.mxu0 %vm94_vm0, %v71_v58 }
  0x6e   :  { %3899 = vmatmul.mubr.msk.f32.gmra.mxu0 %vm94_vm0, %v72_v59 }
  0x6f   :  { %3901 = vmatprep.mubr.msk.f32.mxu0 %vm94_vm0, %v73_v60 }
  0x72   :  { %3902 = vmatmul.mubr.msk.f32.gmra.mxu0 %vm94_vm0, %v74_v61 }
  0x73   :  { %3904 = vmatprep.mubr.msk.f32.mxu0 %vm94_vm0, %v75_v62 }
  0x76   :  { %3905 = vmatmul.mubr.msk.f32.gmra.mxu0 %vm94_vm0, %v76_v63 }
  0x77   :  { %3907 = vmatprep.mubr.msk.f32.mxu0 %vm94_vm0, %v77_v0 }
  0x7a   :  { %3908 = vmatmul.mubr.msk.f32.gmra.mxu0 %vm94_vm0, %v78_v1 }
  0x7b   :  { %3910 = vmatprep.mubr.msk.f32.mxu0 %vm94_vm0, %v79_v2 }
  0x7e   :  { %3911 = vmatmul.mubr.msk.f32.gmra.mxu0 %vm94_vm0, %v80_v3 }
  0x7f   :  { %3913 = vmatprep.mubr.msk.f32.mxu0 %vm94_vm0, %v81_v4 }
  0x82   :  { %3914 = vmatmul.mubr.msk.f32.gmra.mxu0 %vm94_vm0, %v82_v5 }
  0x83   :  { %3916 = vmatprep.mubr.msk.f32.mxu0 %vm94_vm0, %v83_v6 }
  0x86   :  { %3917 = vmatmul.mubr.msk.f32.gmra.mxu0 %vm94_vm0, %v84_v7 }
  0xca   :  { %v3825_v11 = vpop.f32.mrf.mxu0 }
  0xcb   :  { %v359_v12 = vadd.f32 %v3825_v11, %v4834_v10 }
  0xcc   :  { %v353_v13 = vpop.f32.mrf.mxu0 }
  0xcd   :  { %v354_v14 = vadd.f32 %v4834_v10, %v353_v13  ;;  %v673_v19 = vmax.f32 %v359_v12, 0.0 }
  0xce   :  { %v3828_v15 = vpop.f32.mrf.mxu0 }
  0xcf   :  { %v672_v18 = vmax.f32 %v354_v14, 0.0  ;;  %v369_v20 = vadd.f32 %v3828_v15, %v4834_v10 }
  0xd0   :  { %v363_v21 = vpop.f32.mrf.mxu0 }
  0xd1   :  { %v364_v22 = vadd.f32 %v4834_v10, %v363_v21  ;;  %3927 = vmatprep.mubr.msk.f32.mxu1 %vm94_vm0, %v672_v18  ;;  %v675_v26 = vmax.f32 %v369_v20, 0.0 }
  0xd2   :  { %v3831_v23 = vpop.f32.mrf.mxu0  ;;  %3928 = vmatmul.mubr.msk.f32.vlgmr.msra.gmra.mxu1 %vm94_vm0, %v673_v19 }
  0xd3   :  { %v674_v24 = vmax.f32 %v364_v22, 0.0  ;;  %v379_v25 = vadd.f32 %v3831_v23, %v4834_v10 }
  0xd4   :  { %v373_v27 = vpop.f32.mrf.mxu0 }
  0xd5   :  { %v374_v28 = vadd.f32 %v4834_v10, %v373_v27  ;;  %3930 = vmatprep.mubr.msk.f32.mxu1 %vm94_vm0, %v674_v24  ;;  %v677_v29 = vmax.f32 %v379_v25, 0.0 }
  0xd6   :  { %v3834_v30 = vpop.f32.mrf.mxu0  ;;  %3931 = vmatmul.mubr.msk.f32.gmra.mxu1 %vm94_vm0, %v675_v26 }
  0xd7   :  { %v676_v31 = vmax.f32 %v374_v28, 0.0  ;;  %v389_v32 = vadd.f32 %v3834_v30, %v4834_v10 }
  0xd8   :  { %v383_v33 = vpop.f32.mrf.mxu0 }
  0xd9   :  { %v384_v34 = vadd.f32 %v4834_v10, %v383_v33  ;;  %3933 = vmatprep.mubr.msk.f32.mxu1 %vm94_vm0, %v676_v31  ;;  %v679_v35 = vmax.f32 %v389_v32, 0.0 }
  0xda   :  { %v3837_v36 = vpop.f32.mrf.mxu0  ;;  %3934 = vmatmul.mubr.msk.f32.gmra.mxu1 %vm94_vm0, %v677_v29 }
  0xdb   :  { %v678_v37 = vmax.f32 %v384_v34, 0.0  ;;  %v399_v38 = vadd.f32 %v3837_v36, %v4834_v10 }
  0xdc   :  { %v393_v39 = vpop.f32.mrf.mxu0 }
  0xdd   :  { %v394_v40 = vadd.f32 %v4834_v10, %v393_v39  ;;  %3936 = vmatprep.mubr.msk.f32.mxu1 %vm94_vm0, %v678_v37  ;;  %v681_v41 = vmax.f32 %v399_v38, 0.0 }
  0xde   :  { %v3840_v42 = vpop.f32.mrf.mxu0  ;;  %3937 = vmatmul.mubr.msk.f32.gmra.mxu1 %vm94_vm0, %v679_v35 }
  0xdf   :  { %v680_v43 = vmax.f32 %v394_v40, 0.0  ;;  %v409_v44 = vadd.f32 %v3840_v42, %v4834_v10 }
  0xe0   :  { %v403_v45 = vpop.f32.mrf.mxu0 }
  0xe1   :  { %v404_v46 = vadd.f32 %v4834_v10, %v403_v45  ;;  %3939 = vmatprep.mubr.msk.f32.mxu1 %vm94_vm0, %v680_v43  ;;  %v683_v47 = vmax.f32 %v409_v44, 0.0 }
  0xe2   :  { %v3843_v48 = vpop.f32.mrf.mxu0  ;;  %3940 = vmatmul.mubr.msk.f32.gmra.mxu1 %vm94_vm0, %v681_v41 }
  0xe3   :  { %v682_v49 = vmax.f32 %v404_v46, 0.0  ;;  %v419_v50 = vadd.f32 %v3843_v48, %v4834_v10 }
  0xe4   :  { %v413_v51 = vpop.f32.mrf.mxu0 }
  0xe5   :  { %v414_v52 = vadd.f32 %v4834_v10, %v413_v51  ;;  %3942 = vmatprep.mubr.msk.f32.mxu1 %vm94_vm0, %v682_v49  ;;  %v685_v53 = vmax.f32 %v419_v50, 0.0 }
  0xe6   :  { %v3846_v54 = vpop.f32.mrf.mxu0  ;;  %3943 = vmatmul.mubr.msk.f32.gmra.mxu1 %vm94_vm0, %v683_v47 }
  0xe7   :  { %v684_v55 = vmax.f32 %v414_v52, 0.0  ;;  %v429_v56 = vadd.f32 %v3846_v54, %v4834_v10 }
  0xe8   :  { %v423_v57 = vpop.f32.mrf.mxu0 }
  0xe9   :  { %v424_v58 = vadd.f32 %v4834_v10, %v423_v57  ;;  %3945 = vmatprep.mubr.msk.f32.mxu1 %vm94_vm0, %v684_v55  ;;  %v687_v59 = vmax.f32 %v429_v56, 0.0 }
  0xea   :  { %v3849_v60 = vpop.f32.mrf.mxu0  ;;  %3946 = vmatmul.mubr.msk.f32.gmra.mxu1 %vm94_vm0, %v685_v53 }
  0xeb   :  { %v686_v61 = vmax.f32 %v424_v58, 0.0  ;;  %v439_v62 = vadd.f32 %v3849_v60, %v4834_v10 }
  0xec   :  { %v433_v63 = vpop.f32.mrf.mxu0 }
  0xed   :  { %v434_v0 = vadd.f32 %v4834_v10, %v433_v63  ;;  %3948 = vmatprep.mubr.msk.f32.mxu1 %vm94_vm0, %v686_v61  ;;  %v689_v1 = vmax.f32 %v439_v62, 0.0 }
  0xee   :  { %v3852_v2 = vpop.f32.mrf.mxu0  ;;  %3949 = vmatmul.mubr.msk.f32.gmra.mxu1 %vm94_vm0, %v687_v59 }
  0xef   :  { %v688_v3 = vmax.f32 %v434_v0, 0.0  ;;  %v449_v4 = vadd.f32 %v3852_v2, %v4834_v10 }
  0xf0   :  { %v443_v5 = vpop.f32.mrf.mxu0 }
  0xf1   :  { %v444_v6 = vadd.f32 %v4834_v10, %v443_v5  ;;  %3951 = vmatprep.mubr.msk.f32.mxu1 %vm94_vm0, %v688_v3  ;;  %v691_v7 = vmax.f32 %v449_v4, 0.0 }
  0xf2   :  { %v3855_v8 = vpop.f32.mrf.mxu0  ;;  %3952 = vmatmul.mubr.msk.f32.gmra.mxu1 %vm94_vm0, %v689_v1 }
  0xf3   :  { %v690_v9 = vmax.f32 %v444_v6, 0.0  ;;  %v459_v11 = vadd.f32 %v3855_v8, %v4834_v10 }
  0xf4   :  { %v453_v12 = vpop.f32.mrf.mxu0 }
  0xf5   :  { %v454_v13 = vadd.f32 %v4834_v10, %v453_v12  ;;  %3954 = vmatprep.mubr.msk.f32.mxu1 %vm94_vm0, %v690_v9  ;;  %v693_v14 = vmax.f32 %v459_v11, 0.0 }
  0xf6   :  { %v3858_v15 = vpop.f32.mrf.mxu0  ;;  %3955 = vmatmul.mubr.msk.f32.gmra.mxu1 %vm94_vm0, %v691_v7 }
  0xf7   :  { %v692_v16 = vmax.f32 %v454_v13, 0.0  ;;  %v469_v17 = vadd.f32 %v3858_v15, %v4834_v10 }
  0xf8   :  { %v463_v18 = vpop.f32.mrf.mxu0 }
  0xf9   :  { %v464_v19 = vadd.f32 %v4834_v10, %v463_v18  ;;  %3957 = vmatprep.mubr.msk.f32.mxu1 %vm94_vm0, %v692_v16  ;;  %v695_v20 = vmax.f32 %v469_v17, 0.0 }
  0xfa   :  { %v3861_v21 = vpop.f32.mrf.mxu0  ;;  %3958 = vmatmul.mubr.msk.f32.gmra.mxu1 %vm94_vm0, %v693_v14 }
  0xfb   :  { %v694_v22 = vmax.f32 %v464_v19, 0.0  ;;  %v479_v23 = vadd.f32 %v3861_v21, %v4834_v10 }
  0xfc   :  { %v473_v24 = vpop.f32.mrf.mxu0 }
  0xfd   :  { %v474_v25 = vadd.f32 %v4834_v10, %v473_v24  ;;  %3960 = vmatprep.mubr.msk.f32.mxu1 %vm94_vm0, %v694_v22  ;;  %v697_v26 = vmax.f32 %v479_v23, 0.0 }
  0xfe   :  { %v3864_v27 = vpop.f32.mrf.mxu0  ;;  %3961 = vmatmul.mubr.msk.f32.gmra.mxu1 %vm94_vm0, %v695_v20 }
  0xff   :  { %v696_v28 = vmax.f32 %v474_v25, 0.0  ;;  %v489_v29 = vadd.f32 %v3864_v27, %v4834_v10 }
 0x100   :  { %v483_v30 = vpop.f32.mrf.mxu0 }
 0x101   :  { %v484_v31 = vadd.f32 %v4834_v10, %v483_v30  ;;  %3963 = vmatprep.mubr.msk.f32.mxu1 %vm94_vm0, %v696_v28  ;;  %v699_v32 = vmax.f32 %v489_v29, 0.0 }
 0x102   :  { %v3867_v33 = vpop.f32.mrf.mxu0  ;;  %3964 = vmatmul.mubr.msk.f32.gmra.mxu1 %vm94_vm0, %v697_v26 }
 0x103   :  { %v698_v34 = vmax.f32 %v484_v31, 0.0  ;;  %v499_v35 = vadd.f32 %v3867_v33, %v4834_v10 }
 0x104   :  { %v493_v36 = vpop.f32.mrf.mxu0 }
 0x105   :  { %v494_v37 = vadd.f32 %v4834_v10, %v493_v36  ;;  %3966 = vmatprep.mubr.msk.f32.mxu1 %vm94_vm0, %v698_v34  ;;  %v701_v38 = vmax.f32 %v499_v35, 0.0 }
 0x106   :  { %v3870_v39 = vpop.f32.mrf.mxu0  ;;  %3967 = vmatmul.mubr.msk.f32.gmra.mxu1 %vm94_vm0, %v699_v32 }
 0x107   :  { %v700_v40 = vmax.f32 %v494_v37, 0.0  ;;  %v509_v41 = vadd.f32 %v3870_v39, %v4834_v10 }
 0x108   :  { %v503_v42 = vpop.f32.mrf.mxu0 }
 0x109   :  { %v504_v43 = vadd.f32 %v4834_v10, %v503_v42  ;;  %3969 = vmatprep.mubr.msk.f32.mxu1 %vm94_vm0, %v700_v40  ;;  %v703_v44 = vmax.f32 %v509_v41, 0.0 }
 0x10a   :  { %v3873_v45 = vpop.f32.mrf.mxu0  ;;  %3970 = vmatmul.mubr.msk.f32.gmra.mxu1 %vm94_vm0, %v701_v38 }
 0x10b   :  { %v702_v46 = vmax.f32 %v504_v43, 0.0  ;;  %v519_v47 = vadd.f32 %v3873_v45, %v4834_v10 }
 0x10c   :  { %v513_v48 = vpop.f32.mrf.mxu0 }
 0x10d   :  { %v514_v49 = vadd.f32 %v4834_v10, %v513_v48  ;;  %3972 = vmatprep.mubr.msk.f32.mxu1 %vm94_vm0, %v702_v46  ;;  %v705_v50 = vmax.f32 %v519_v47, 0.0 }
 0x10e   :  { %v3876_v51 = vpop.f32.mrf.mxu0  ;;  %3973 = vmatmul.mubr.msk.f32.gmra.mxu1 %vm94_vm0, %v703_v44 }
 0x10f   :  { %v704_v52 = vmax.f32 %v514_v49, 0.0  ;;  %v529_v53 = vadd.f32 %v3876_v51, %v4834_v10 }
 0x110   :  { %v523_v54 = vpop.f32.mrf.mxu0 }
 0x111   :  { %v524_v55 = vadd.f32 %v4834_v10, %v523_v54  ;;  %3975 = vmatprep.mubr.msk.f32.mxu1 %vm94_vm0, %v704_v52  ;;  %v707_v56 = vmax.f32 %v529_v53, 0.0 }
 0x112   :  { %v3879_v57 = vpop.f32.mrf.mxu0  ;;  %3976 = vmatmul.mubr.msk.f32.gmra.mxu1 %vm94_vm0, %v705_v50 }
 0x113   :  { %v706_v58 = vmax.f32 %v524_v55, 0.0  ;;  %v539_v59 = vadd.f32 %v3879_v57, %v4834_v10 }
 0x114   :  { %v533_v60 = vpop.f32.mrf.mxu0 }
 0x115   :  { %v534_v61 = vadd.f32 %v4834_v10, %v533_v60  ;;  %3978 = vmatprep.mubr.msk.f32.mxu1 %vm94_vm0, %v706_v58  ;;  %v709_v62 = vmax.f32 %v539_v59, 0.0 }
 0x116   :  { %v3882_v63 = vpop.f32.mrf.mxu0  ;;  %3979 = vmatmul.mubr.msk.f32.gmra.mxu1 %vm94_vm0, %v707_v56 }
 0x117   :  { %v708_v0 = vmax.f32 %v534_v61, 0.0  ;;  %v549_v1 = vadd.f32 %v3882_v63, %v4834_v10 }
 0x118   :  { %v543_v2 = vpop.f32.mrf.mxu0 }
 0x119   :  { %v544_v3 = vadd.f32 %v4834_v10, %v543_v2  ;;  %3981 = vmatprep.mubr.msk.f32.mxu1 %vm94_vm0, %v708_v0  ;;  %v711_v4 = vmax.f32 %v549_v1, 0.0 }
 0x11a   :  { %v3885_v5 = vpop.f32.mrf.mxu0  ;;  %3982 = vmatmul.mubr.msk.f32.gmra.mxu1 %vm94_vm0, %v709_v62 }
 0x11b   :  { %v710_v6 = vmax.f32 %v544_v3, 0.0  ;;  %v559_v7 = vadd.f32 %v3885_v5, %v4834_v10 }
 0x11c   :  { %v553_v8 = vpop.f32.mrf.mxu0 }
 0x11d   :  { %v554_v9 = vadd.f32 %v4834_v10, %v553_v8  ;;  %3984 = vmatprep.mubr.msk.f32.mxu1 %vm94_vm0, %v710_v6  ;;  %v713_v11 = vmax.f32 %v559_v7, 0.0 }
 0x11e   :  { %v3888_v12 = vpop.f32.mrf.mxu0  ;;  %3985 = vmatmul.mubr.msk.f32.gmra.mxu1 %vm94_vm0, %v711_v4 }
 0x11f   :  { %v712_v13 = vmax.f32 %v554_v9, 0.0  ;;  %v569_v14 = vadd.f32 %v3888_v12, %v4834_v10 }
 0x120   :  { %v563_v15 = vpop.f32.mrf.mxu0 }
 0x121   :  { %v564_v16 = vadd.f32 %v4834_v10, %v563_v15  ;;  %3987 = vmatprep.mubr.msk.f32.mxu1 %vm94_vm0, %v712_v13  ;;  %v715_v17 = vmax.f32 %v569_v14, 0.0 }
 0x122   :  { %v3891_v18 = vpop.f32.mrf.mxu0  ;;  %3988 = vmatmul.mubr.msk.f32.gmra.mxu1 %vm94_vm0, %v713_v11 }
 0x123   :  { %v714_v19 = vmax.f32 %v564_v16, 0.0  ;;  %v579_v20 = vadd.f32 %v3891_v18, %v4834_v10  ;;  %v2040_v16 = vld [vmem:[%s5835_s3 + $0x18] sm:$0xff] }
 0x124   :  { %v573_v21 = vpop.f32.mrf.mxu0  ;;  %4127 = vmatprep.subr.mxu1 %v2040_v16 }
 0x125   :  { %v574_v22 = vadd.f32 %v4834_v10, %v573_v21  ;;  %3990 = vmatprep.mubr.msk.f32.mxu1 %vm94_vm0, %v714_v19  ;;  %v717_v23 = vmax.f32 %v579_v20, 0.0  ;;  %4128 = vmatpush3.msra.mxu1 %v2040_v16 }
 0x126   :  { %v3894_v24 = vpop.f32.mrf.mxu0  ;;  %3991 = vmatmul.mubr.msk.f32.gmra.mxu1 %vm94_vm0, %v715_v17  ;;  %v4979_v17 = vld [vmem:[%s5836_s4 + $0x1] ss:$0 sm:$0xff] }
 0x127   :  { %v716_v25 = vmax.f32 %v574_v22, 0.0  ;;  %v589_v26 = vadd.f32 %v3894_v24, %v4834_v10  ;;  %v2037_v24 = vld [vmem:[%s5835_s3] sm:$0xff] }
 0x128   :  { %v583_v27 = vpop.f32.mrf.mxu0 }
 0x129   :  { %v584_v28 = vadd.f32 %v4834_v10, %v583_v27  ;;  %3993 = vmatprep.mubr.msk.f32.mxu1 %vm94_vm0, %v716_v25  ;;  %v719_v29 = vmax.f32 %v589_v26, 0.0 }
 0x12a   :  { %v3897_v30 = vpop.f32.mrf.mxu0  ;;  %3994 = vmatmul.mubr.msk.f32.gmra.mxu1 %vm94_vm0, %v717_v23  ;;  %v2038_v23 = vld [vmem:[%s5835_s3 + $0x8] sm:$0xff] }
 0x12b   :  { %v718_v31 = vmax.f32 %v584_v28, 0.0  ;;  %v599_v32 = vadd.f32 %v3897_v30, %v4834_v10 }
 0x12c   :  { %v593_v33 = vpop.f32.mrf.mxu0 }
 0x12d   :  { %v594_v34 = vadd.f32 %v4834_v10, %v593_v33  ;;  %3996 = vmatprep.mubr.msk.f32.mxu1 %vm94_vm0, %v718_v31  ;;  %v721_v35 = vmax.f32 %v599_v32, 0.0 }
 0x12e   :  { %v3900_v36 = vpop.f32.mrf.mxu0  ;;  %3997 = vmatmul.mubr.msk.f32.gmra.mxu1 %vm94_vm0, %v719_v29 }
 0x12f   :  { %v720_v37 = vmax.f32 %v594_v34, 0.0  ;;  %v609_v38 = vadd.f32 %v3900_v36, %v4834_v10 }
 0x130   :  { %v603_v39 = vpop.f32.mrf.mxu0 }
 0x131   :  { %v604_v40 = vadd.f32 %v4834_v10, %v603_v39  ;;  %3999 = vmatprep.mubr.msk.f32.mxu1 %vm94_vm0, %v720_v37  ;;  %v723_v41 = vmax.f32 %v609_v38, 0.0 }
 0x132   :  { %v3903_v42 = vpop.f32.mrf.mxu0  ;;  %4000 = vmatmul.mubr.msk.f32.gmra.mxu1 %vm94_vm0, %v721_v35 }
 0x133   :  { %v722_v43 = vmax.f32 %v604_v40, 0.0  ;;  %v619_v44 = vadd.f32 %v3903_v42, %v4834_v10 }
 0x134   :  { %v613_v45 = vpop.f32.mrf.mxu0 }
 0x135   :  { %v614_v46 = vadd.f32 %v4834_v10, %v613_v45  ;;  %4002 = vmatprep.mubr.msk.f32.mxu1 %vm94_vm0, %v722_v43  ;;  %v725_v47 = vmax.f32 %v619_v44, 0.0 }
 0x136   :  { %v3906_v48 = vpop.f32.mrf.mxu0  ;;  %4003 = vmatmul.mubr.msk.f32.gmra.mxu1 %vm94_vm0, %v723_v41 }
 0x137   :  { %v724_v49 = vmax.f32 %v614_v46, 0.0  ;;  %v629_v50 = vadd.f32 %v3906_v48, %v4834_v10 }
 0x138   :  { %v623_v51 = vpop.f32.mrf.mxu0 }
 0x139   :  { %v624_v52 = vadd.f32 %v4834_v10, %v623_v51  ;;  %4005 = vmatprep.mubr.msk.f32.mxu1 %vm94_vm0, %v724_v49  ;;  %v727_v53 = vmax.f32 %v629_v50, 0.0 }
 0x13a   :  { %v3909_v54 = vpop.f32.mrf.mxu0  ;;  %4006 = vmatmul.mubr.msk.f32.gmra.mxu1 %vm94_vm0, %v725_v47 }
 0x13b   :  { %v726_v55 = vmax.f32 %v624_v52, 0.0  ;;  %v639_v56 = vadd.f32 %v3909_v54, %v4834_v10 }
 0x13c   :  { %v633_v57 = vpop.f32.mrf.mxu0 }
 0x13d   :  { %v634_v58 = vadd.f32 %v4834_v10, %v633_v57  ;;  %4008 = vmatprep.mubr.msk.f32.mxu1 %vm94_vm0, %v726_v55  ;;  %v729_v59 = vmax.f32 %v639_v56, 0.0 }
 0x13e   :  { %v3912_v60 = vpop.f32.mrf.mxu0  ;;  %4009 = vmatmul.mubr.msk.f32.gmra.mxu1 %vm94_vm0, %v727_v53 }
 0x13f   :  { %v728_v61 = vmax.f32 %v634_v58, 0.0  ;;  %v649_v62 = vadd.f32 %v3912_v60, %v4834_v10 }
 0x140   :  { %v643_v63 = vpop.f32.mrf.mxu0 }
 0x141   :  { %v644_v0 = vadd.f32 %v4834_v10, %v643_v63  ;;  %4011 = vmatprep.mubr.msk.f32.mxu1 %vm94_vm0, %v728_v61  ;;  %v731_v1 = vmax.f32 %v649_v62, 0.0 }
 0x142   :  { %v3915_v2 = vpop.f32.mrf.mxu0  ;;  %4012 = vmatmul.mubr.msk.f32.gmra.mxu1 %vm94_vm0, %v729_v59 }
 0x143   :  { %v730_v3 = vmax.f32 %v644_v0, 0.0  ;;  %v659_v4 = vadd.f32 %v3915_v2, %v4834_v10 }
 0x144   :  { %v653_v5 = vpop.f32.mrf.mxu0 }
 0x145   :  { %v654_v6 = vadd.f32 %v4834_v10, %v653_v5  ;;  %4014 = vmatprep.mubr.msk.f32.mxu1 %vm94_vm0, %v730_v3  ;;  %v733_v7 = vmax.f32 %v659_v4, 0.0 }
 0x146   :  { %v3918_v8 = vpop.f32.mrf.mxu0  ;;  %4015 = vmatmul.mubr.msk.f32.gmra.mxu1 %vm94_vm0, %v731_v1 }
 0x147   :  { %v732_v9 = vmax.f32 %v654_v6, 0.0  ;;  %v669_v11 = vadd.f32 %v3918_v8, %v4834_v10 }
 0x148   :  { %v663_v12 = vpop.f32.mrf.mxu0 }
 0x149   :  { %v664_v13 = vadd.f32 %v4834_v10, %v663_v12  ;;  %4017 = vmatprep.mubr.msk.f32.mxu1 %vm94_vm0, %v732_v9  ;;  %v735_v14 = vmax.f32 %v669_v11, 0.0  ;;  %v2039_v10 = vld [vmem:[%s5835_s3 + $0x10] sm:$0xff] }
 0x14a   :  { %4018 = vmatmul.mubr.msk.f32.gmra.mxu1 %vm94_vm0, %v733_v7  ;;  %4129 = vmatprep.subr.mxu1 %v2039_v10 }
 0x14b   :  { %v734_v15 = vmax.f32 %v664_v13, 0.0  ;;  %4130 = vmatpush3.msra.mxu1 %v2039_v10 }
 0x14c   :  { %4131 = vmatprep.subr.mxu1 %v2038_v23 }
 0x14d   :  { %4020 = vmatprep.mubr.msk.f32.mxu1 %vm94_vm0, %v734_v15  ;;  %4132 = vmatpush3.msra.mxu1 %v2038_v23 }
 0x14e   :  { %4021 = vmatmul.mubr.msk.f32.gmra.mxu1 %vm94_vm0, %v735_v14  ;;  %4133 = vmatprep.subr.mxu1 %v2037_v24 }
 0x14f   :  { %4134 = vmatpush3.msra.mxu1 %v2037_v24 }
 0x192   :  { %v3929_v18 = vpop.f32.mrf.mxu1 }
 0x193   :  { %v1009_v19 = vadd.f32 %v3929_v18, %v4979_v17 }
 0x194   :  { %v1003_v20 = vpop.f32.mrf.mxu1 }
 0x195   :  { %v1004_v21 = vadd.f32 %v4979_v17, %v1003_v20  ;;  %v1323_v26 = vmax.f32 %v1009_v19, 0.0 }
 0x196   :  { %v3932_v22 = vpop.f32.mrf.mxu1 }
 0x197   :  { %v1322_v25 = vmax.f32 %v1004_v21, 0.0  ;;  %v1019_v27 = vadd.f32 %v3932_v22, %v4979_v17 }
 0x198   :  { %v1013_v28 = vpop.f32.mrf.mxu1 }
 0x199   :  { %v1014_v29 = vadd.f32 %v4979_v17, %v1013_v28  ;;  %4031 = vmatprep.mubr.msk.f32.mxu0 %vm94_vm0, %v1322_v25  ;;  %v1325_v32 = vmax.f32 %v1019_v27, 0.0 }
 0x19a   :  { %v3935_v30 = vpop.f32.mrf.mxu1  ;;  %4032 = vmatmul.mubr.msk.f32.vlgmr.msra.gmra.mxu0 %vm94_vm0, %v1323_v26 }
 0x19b   :  { %v1324_v31 = vmax.f32 %v1014_v29, 0.0  ;;  %v1029_v33 = vadd.f32 %v3935_v30, %v4979_v17 }
 0x19c   :  { %v1023_v34 = vpop.f32.mrf.mxu1 }
 0x19d   :  { %v1024_v35 = vadd.f32 %v4979_v17, %v1023_v34  ;;  %4034 = vmatprep.mubr.msk.f32.mxu0 %vm94_vm0, %v1324_v31  ;;  %v1327_v38 = vmax.f32 %v1029_v33, 0.0 }
 0x19e   :  { %v3938_v36 = vpop.f32.mrf.mxu1  ;;  %4035 = vmatmul.mubr.msk.f32.gmra.mxu0 %vm94_vm0, %v1325_v32 }
 0x19f   :  { %v1326_v37 = vmax.f32 %v1024_v35, 0.0  ;;  %v1039_v39 = vadd.f32 %v3938_v36, %v4979_v17 }
 0x1a0   :  { %v1033_v40 = vpop.f32.mrf.mxu1 }
 0x1a1   :  { %v1034_v41 = vadd.f32 %v4979_v17, %v1033_v40  ;;  %4037 = vmatprep.mubr.msk.f32.mxu0 %vm94_vm0, %v1326_v37  ;;  %v1329_v44 = vmax.f32 %v1039_v39, 0.0 }
 0x1a2   :  { %v3941_v42 = vpop.f32.mrf.mxu1  ;;  %4038 = vmatmul.mubr.msk.f32.gmra.mxu0 %vm94_vm0, %v1327_v38 }
 0x1a3   :  { %v1328_v43 = vmax.f32 %v1034_v41, 0.0  ;;  %v1049_v45 = vadd.f32 %v3941_v42, %v4979_v17 }
 0x1a4   :  { %v1043_v46 = vpop.f32.mrf.mxu1 }
 0x1a5   :  { %v1044_v47 = vadd.f32 %v4979_v17, %v1043_v46  ;;  %4040 = vmatprep.mubr.msk.f32.mxu0 %vm94_vm0, %v1328_v43  ;;  %v1331_v50 = vmax.f32 %v1049_v45, 0.0 }
 0x1a6   :  { %v3944_v48 = vpop.f32.mrf.mxu1  ;;  %4041 = vmatmul.mubr.msk.f32.gmra.mxu0 %vm94_vm0, %v1329_v44 }
 0x1a7   :  { %v1330_v49 = vmax.f32 %v1044_v47, 0.0  ;;  %v1059_v51 = vadd.f32 %v3944_v48, %v4979_v17 }
 0x1a8   :  { %v1053_v52 = vpop.f32.mrf.mxu1 }
 0x1a9   :  { %v1054_v53 = vadd.f32 %v4979_v17, %v1053_v52  ;;  %4043 = vmatprep.mubr.msk.f32.mxu0 %vm94_vm0, %v1330_v49  ;;  %v1333_v56 = vmax.f32 %v1059_v51, 0.0 }
 0x1aa   :  { %v3947_v54 = vpop.f32.mrf.mxu1  ;;  %4044 = vmatmul.mubr.msk.f32.gmra.mxu0 %vm94_vm0, %v1331_v50 }
 0x1ab   :  { %v1332_v55 = vmax.f32 %v1054_v53, 0.0  ;;  %v1069_v57 = vadd.f32 %v3947_v54, %v4979_v17 }
 0x1ac   :  { %v1063_v58 = vpop.f32.mrf.mxu1 }
 0x1ad   :  { %v1064_v59 = vadd.f32 %v4979_v17, %v1063_v58  ;;  %4046 = vmatprep.mubr.msk.f32.mxu0 %vm94_vm0, %v1332_v55  ;;  %v1335_v62 = vmax.f32 %v1069_v57, 0.0 }
 0x1ae   :  { %v3950_v60 = vpop.f32.mrf.mxu1  ;;  %4047 = vmatmul.mubr.msk.f32.gmra.mxu0 %vm94_vm0, %v1333_v56 }
 0x1af   :  { %v1334_v61 = vmax.f32 %v1064_v59, 0.0  ;;  %v1079_v63 = vadd.f32 %v3950_v60, %v4979_v17 }
 0x1b0   :  { %v1073_v0 = vpop.f32.mrf.mxu1 }
 0x1b1   :  { %v1074_v1 = vadd.f32 %v4979_v17, %v1073_v0  ;;  %4049 = vmatprep.mubr.msk.f32.mxu0 %vm94_vm0, %v1334_v61  ;;  %v1337_v4 = vmax.f32 %v1079_v63, 0.0 }
 0x1b2   :  { %v3953_v2 = vpop.f32.mrf.mxu1  ;;  %4050 = vmatmul.mubr.msk.f32.gmra.mxu0 %vm94_vm0, %v1335_v62 }
 0x1b3   :  { %v1336_v3 = vmax.f32 %v1074_v1, 0.0  ;;  %v1089_v5 = vadd.f32 %v3953_v2, %v4979_v17 }
 0x1b4   :  { %v1083_v6 = vpop.f32.mrf.mxu1 }
 0x1b5   :  { %v1084_v7 = vadd.f32 %v4979_v17, %v1083_v6  ;;  %4052 = vmatprep.mubr.msk.f32.mxu0 %vm94_vm0, %v1336_v3  ;;  %v1339_v11 = vmax.f32 %v1089_v5, 0.0 }
 0x1b6   :  { %v3956_v8 = vpop.f32.mrf.mxu1  ;;  %4053 = vmatmul.mubr.msk.f32.gmra.mxu0 %vm94_vm0, %v1337_v4 }
 0x1b7   :  { %v1338_v9 = vmax.f32 %v1084_v7, 0.0  ;;  %v1099_v12 = vadd.f32 %v3956_v8, %v4979_v17 }
 0x1b8   :  { %v1093_v13 = vpop.f32.mrf.mxu1 }
 0x1b9   :  { %v1094_v14 = vadd.f32 %v4979_v17, %v1093_v13  ;;  %4055 = vmatprep.mubr.msk.f32.mxu0 %vm94_vm0, %v1338_v9  ;;  %v1341_v10 = vmax.f32 %v1099_v12, 0.0 }
 0x1ba   :  { %v3959_v15 = vpop.f32.mrf.mxu1  ;;  %4056 = vmatmul.mubr.msk.f32.gmra.mxu0 %vm94_vm0, %v1339_v11 }
 0x1bb   :  { %v1340_v16 = vmax.f32 %v1094_v14, 0.0  ;;  %v1109_v18 = vadd.f32 %v3959_v15, %v4979_v17 }
 0x1bc   :  { %v1103_v19 = vpop.f32.mrf.mxu1 }
 0x1bd   :  { %v1104_v20 = vadd.f32 %v4979_v17, %v1103_v19  ;;  %4058 = vmatprep.mubr.msk.f32.mxu0 %vm94_vm0, %v1340_v16  ;;  %v1343_v23 = vmax.f32 %v1109_v18, 0.0 }
 0x1be   :  { %v3962_v21 = vpop.f32.mrf.mxu1  ;;  %4059 = vmatmul.mubr.msk.f32.gmra.mxu0 %vm94_vm0, %v1341_v10 }
 0x1bf   :  { %v1342_v22 = vmax.f32 %v1104_v20, 0.0  ;;  %v1119_v24 = vadd.f32 %v3962_v21, %v4979_v17 }
 0x1c0   :  { %v1113_v25 = vpop.f32.mrf.mxu1 }
 0x1c1   :  { %v1114_v26 = vadd.f32 %v4979_v17, %v1113_v25  ;;  %4061 = vmatprep.mubr.msk.f32.mxu0 %vm94_vm0, %v1342_v22  ;;  %v1345_v29 = vmax.f32 %v1119_v24, 0.0 }
 0x1c2   :  { %v3965_v27 = vpop.f32.mrf.mxu1  ;;  %4062 = vmatmul.mubr.msk.f32.gmra.mxu0 %vm94_vm0, %v1343_v23 }
 0x1c3   :  { %v1344_v28 = vmax.f32 %v1114_v26, 0.0  ;;  %v1129_v30 = vadd.f32 %v3965_v27, %v4979_v17 }
 0x1c4   :  { %v1123_v31 = vpop.f32.mrf.mxu1 }
 0x1c5   :  { %v1124_v32 = vadd.f32 %v4979_v17, %v1123_v31  ;;  %4064 = vmatprep.mubr.msk.f32.mxu0 %vm94_vm0, %v1344_v28  ;;  %v1347_v35 = vmax.f32 %v1129_v30, 0.0 }
 0x1c6   :  { %v3968_v33 = vpop.f32.mrf.mxu1  ;;  %4065 = vmatmul.mubr.msk.f32.gmra.mxu0 %vm94_vm0, %v1345_v29 }
 0x1c7   :  { %v1346_v34 = vmax.f32 %v1124_v32, 0.0  ;;  %v1139_v36 = vadd.f32 %v3968_v33, %v4979_v17 }
 0x1c8   :  { %v1133_v37 = vpop.f32.mrf.mxu1 }
 0x1c9   :  { %v1134_v38 = vadd.f32 %v4979_v17, %v1133_v37  ;;  %4067 = vmatprep.mubr.msk.f32.mxu0 %vm94_vm0, %v1346_v34  ;;  %v1349_v41 = vmax.f32 %v1139_v36, 0.0 }
 0x1ca   :  { %v3971_v39 = vpop.f32.mrf.mxu1  ;;  %4068 = vmatmul.mubr.msk.f32.gmra.mxu0 %vm94_vm0, %v1347_v35 }
 0x1cb   :  { %v1348_v40 = vmax.f32 %v1134_v38, 0.0  ;;  %v1149_v42 = vadd.f32 %v3971_v39, %v4979_v17 }
 0x1cc   :  { %v1143_v43 = vpop.f32.mrf.mxu1 }
 0x1cd   :  { %v1144_v44 = vadd.f32 %v4979_v17, %v1143_v43  ;;  %4070 = vmatprep.mubr.msk.f32.mxu0 %vm94_vm0, %v1348_v40  ;;  %v1351_v47 = vmax.f32 %v1149_v42, 0.0 }
 0x1ce   :  { %v3974_v45 = vpop.f32.mrf.mxu1  ;;  %4071 = vmatmul.mubr.msk.f32.gmra.mxu0 %vm94_vm0, %v1349_v41 }
 0x1cf   :  { %v1350_v46 = vmax.f32 %v1144_v44, 0.0  ;;  %v1159_v48 = vadd.f32 %v3974_v45, %v4979_v17 }
 0x1d0   :  { %v1153_v49 = vpop.f32.mrf.mxu1 }
 0x1d1   :  { %v1154_v50 = vadd.f32 %v4979_v17, %v1153_v49  ;;  %4073 = vmatprep.mubr.msk.f32.mxu0 %vm94_vm0, %v1350_v46  ;;  %v1353_v53 = vmax.f32 %v1159_v48, 0.0 }
 0x1d2   :  { %v3977_v51 = vpop.f32.mrf.mxu1  ;;  %4074 = vmatmul.mubr.msk.f32.gmra.mxu0 %vm94_vm0, %v1351_v47 }
 0x1d3   :  { %v1352_v52 = vmax.f32 %v1154_v50, 0.0  ;;  %v1169_v54 = vadd.f32 %v3977_v51, %v4979_v17 }
 0x1d4   :  { %v1163_v55 = vpop.f32.mrf.mxu1 }
 0x1d5   :  { %v1164_v56 = vadd.f32 %v4979_v17, %v1163_v55  ;;  %4076 = vmatprep.mubr.msk.f32.mxu0 %vm94_vm0, %v1352_v52  ;;  %v1355_v59 = vmax.f32 %v1169_v54, 0.0 }
 0x1d6   :  { %v3980_v57 = vpop.f32.mrf.mxu1  ;;  %4077 = vmatmul.mubr.msk.f32.gmra.mxu0 %vm94_vm0, %v1353_v53 }
 0x1d7   :  { %v1354_v58 = vmax.f32 %v1164_v56, 0.0  ;;  %v1179_v60 = vadd.f32 %v3980_v57, %v4979_v17 }
 0x1d8   :  { %v1173_v61 = vpop.f32.mrf.mxu1 }
 0x1d9   :  { %v1174_v62 = vadd.f32 %v4979_v17, %v1173_v61  ;;  %4079 = vmatprep.mubr.msk.f32.mxu0 %vm94_vm0, %v1354_v58  ;;  %v1357_v1 = vmax.f32 %v1179_v60, 0.0 }
 0x1da   :  { %v3983_v63 = vpop.f32.mrf.mxu1  ;;  %4080 = vmatmul.mubr.msk.f32.gmra.mxu0 %vm94_vm0, %v1355_v59 }
 0x1db   :  { %v1356_v0 = vmax.f32 %v1174_v62, 0.0  ;;  %v1189_v2 = vadd.f32 %v3983_v63, %v4979_v17 }
 0x1dc   :  { %v1183_v3 = vpop.f32.mrf.mxu1 }
 0x1dd   :  { %v1184_v4 = vadd.f32 %v4979_v17, %v1183_v3  ;;  %4082 = vmatprep.mubr.msk.f32.mxu0 %vm94_vm0, %v1356_v0  ;;  %v1359_v7 = vmax.f32 %v1189_v2, 0.0 }
 0x1de   :  { %v3986_v5 = vpop.f32.mrf.mxu1  ;;  %4083 = vmatmul.mubr.msk.f32.gmra.mxu0 %vm94_vm0, %v1357_v1 }
 0x1df   :  { %v1358_v6 = vmax.f32 %v1184_v4, 0.0  ;;  %v1199_v8 = vadd.f32 %v3986_v5, %v4979_v17 }
 0x1e0   :  { %v1193_v9 = vpop.f32.mrf.mxu1 }
 0x1e1   :  { %v1194_v11 = vadd.f32 %v4979_v17, %v1193_v9  ;;  %4085 = vmatprep.mubr.msk.f32.mxu0 %vm94_vm0, %v1358_v6  ;;  %v1361_v14 = vmax.f32 %v1199_v8, 0.0 }
 0x1e2   :  { %v3989_v12 = vpop.f32.mrf.mxu1  ;;  %4086 = vmatmul.mubr.msk.f32.gmra.mxu0 %vm94_vm0, %v1359_v7 }
 0x1e3   :  { %v1360_v13 = vmax.f32 %v1194_v11, 0.0  ;;  %v1209_v15 = vadd.f32 %v3989_v12, %v4979_v17 }
 0x1e4   :  { %v1203_v16 = vpop.f32.mrf.mxu1 }
 0x1e5   :  { %v1204_v10 = vadd.f32 %v4979_v17, %v1203_v16  ;;  %4088 = vmatprep.mubr.msk.f32.mxu0 %vm94_vm0, %v1360_v13  ;;  %v1363_v20 = vmax.f32 %v1209_v15, 0.0 }
 0x1e6   :  { %v3992_v18 = vpop.f32.mrf.mxu1  ;;  %4089 = vmatmul.mubr.msk.f32.gmra.mxu0 %vm94_vm0, %v1361_v14 }
 0x1e7   :  { %v1362_v19 = vmax.f32 %v1204_v10, 0.0  ;;  %v1219_v21 = vadd.f32 %v3992_v18, %v4979_v17 }
 0x1e8   :  { %v1213_v22 = vpop.f32.mrf.mxu1 }
 0x1e9   :  { %v1214_v23 = vadd.f32 %v4979_v17, %v1213_v22  ;;  %4091 = vmatprep.mubr.msk.f32.mxu0 %vm94_vm0, %v1362_v19  ;;  %v1365_v26 = vmax.f32 %v1219_v21, 0.0 }
 0x1ea   :  { %v3995_v24 = vpop.f32.mrf.mxu1  ;;  %4092 = vmatmul.mubr.msk.f32.gmra.mxu0 %vm94_vm0, %v1363_v20 }
 0x1eb   :  { %v1364_v25 = vmax.f32 %v1214_v23, 0.0  ;;  %v1229_v27 = vadd.f32 %v3995_v24, %v4979_v17  ;;  %v5118_v23 = vld [vmem:[%s5836_s4 + $0x2] ss:$0 sm:$0xff] }
 0x1ec   :  { %v1223_v28 = vpop.f32.mrf.mxu1 }
 0x1ed   :  { %v1224_v29 = vadd.f32 %v4979_v17, %v1223_v28  ;;  %4094 = vmatprep.mubr.msk.f32.mxu0 %vm94_vm0, %v1364_v25  ;;  %v1367_v32 = vmax.f32 %v1229_v27, 0.0 }
 0x1ee   :  { %v3998_v30 = vpop.f32.mrf.mxu1  ;;  %4095 = vmatmul.mubr.msk.f32.gmra.mxu0 %vm94_vm0, %v1365_v26 }
 0x1ef   :  { %v1366_v31 = vmax.f32 %v1224_v29, 0.0  ;;  %v1239_v33 = vadd.f32 %v3998_v30, %v4979_v17 }
 0x1f0   :  { %v1233_v34 = vpop.f32.mrf.mxu1 }
 0x1f1   :  { %v1234_v35 = vadd.f32 %v4979_v17, %v1233_v34  ;;  %4097 = vmatprep.mubr.msk.f32.mxu0 %vm94_vm0, %v1366_v31  ;;  %v1369_v38 = vmax.f32 %v1239_v33, 0.0 }
 0x1f2   :  { %v4001_v36 = vpop.f32.mrf.mxu1  ;;  %4098 = vmatmul.mubr.msk.f32.gmra.mxu0 %vm94_vm0, %v1367_v32 }
 0x1f3   :  { %v1368_v37 = vmax.f32 %v1234_v35, 0.0  ;;  %v1249_v39 = vadd.f32 %v4001_v36, %v4979_v17 }
 0x1f4   :  { %v1243_v40 = vpop.f32.mrf.mxu1 }
 0x1f5   :  { %v1244_v41 = vadd.f32 %v4979_v17, %v1243_v40  ;;  %4100 = vmatprep.mubr.msk.f32.mxu0 %vm94_vm0, %v1368_v37  ;;  %v1371_v44 = vmax.f32 %v1249_v39, 0.0 }
 0x1f6   :  { %v4004_v42 = vpop.f32.mrf.mxu1  ;;  %4101 = vmatmul.mubr.msk.f32.gmra.mxu0 %vm94_vm0, %v1369_v38 }
 0x1f7   :  { %v1370_v43 = vmax.f32 %v1244_v41, 0.0  ;;  %v1259_v45 = vadd.f32 %v4004_v42, %v4979_v17 }
 0x1f8   :  { %v1253_v46 = vpop.f32.mrf.mxu1 }
 0x1f9   :  { %v1254_v47 = vadd.f32 %v4979_v17, %v1253_v46  ;;  %4103 = vmatprep.mubr.msk.f32.mxu0 %vm94_vm0, %v1370_v43  ;;  %v1373_v50 = vmax.f32 %v1259_v45, 0.0 }
 0x1fa   :  { %v4007_v48 = vpop.f32.mrf.mxu1  ;;  %4104 = vmatmul.mubr.msk.f32.gmra.mxu0 %vm94_vm0, %v1371_v44 }
 0x1fb   :  { %v1372_v49 = vmax.f32 %v1254_v47, 0.0  ;;  %v1269_v51 = vadd.f32 %v4007_v48, %v4979_v17 }
 0x1fc   :  { %v1263_v52 = vpop.f32.mrf.mxu1 }
 0x1fd   :  { %v1264_v53 = vadd.f32 %v4979_v17, %v1263_v52  ;;  %4106 = vmatprep.mubr.msk.f32.mxu0 %vm94_vm0, %v1372_v49  ;;  %v1375_v56 = vmax.f32 %v1269_v51, 0.0 }
 0x1fe   :  { %v4010_v54 = vpop.f32.mrf.mxu1  ;;  %4107 = vmatmul.mubr.msk.f32.gmra.mxu0 %vm94_vm0, %v1373_v50 }
 0x1ff   :  { %v1374_v55 = vmax.f32 %v1264_v53, 0.0  ;;  %v1279_v57 = vadd.f32 %v4010_v54, %v4979_v17 }
 0x200   :  { %v1273_v58 = vpop.f32.mrf.mxu1 }
 0x201   :  { %v1274_v59 = vadd.f32 %v4979_v17, %v1273_v58  ;;  %4109 = vmatprep.mubr.msk.f32.mxu0 %vm94_vm0, %v1374_v55  ;;  %v1377_v62 = vmax.f32 %v1279_v57, 0.0 }
 0x202   :  { %v4013_v60 = vpop.f32.mrf.mxu1  ;;  %4110 = vmatmul.mubr.msk.f32.gmra.mxu0 %vm94_vm0, %v1375_v56 }
 0x203   :  { %v1376_v61 = vmax.f32 %v1274_v59, 0.0  ;;  %v1289_v63 = vadd.f32 %v4013_v60, %v4979_v17 }
 0x204   :  { %v1283_v0 = vpop.f32.mrf.mxu1 }
 0x205   :  { %v1284_v1 = vadd.f32 %v4979_v17, %v1283_v0  ;;  %4112 = vmatprep.mubr.msk.f32.mxu0 %vm94_vm0, %v1376_v61  ;;  %v1379_v4 = vmax.f32 %v1289_v63, 0.0 }
 0x206   :  { %v4016_v2 = vpop.f32.mrf.mxu1  ;;  %4113 = vmatmul.mubr.msk.f32.gmra.mxu0 %vm94_vm0, %v1377_v62 }
 0x207   :  { %v1378_v3 = vmax.f32 %v1284_v1, 0.0  ;;  %v1299_v5 = vadd.f32 %v4016_v2, %v4979_v17 }
 0x208   :  { %v1293_v6 = vpop.f32.mrf.mxu1 }
 0x209   :  { %v1294_v7 = vadd.f32 %v4979_v17, %v1293_v6  ;;  %4115 = vmatprep.mubr.msk.f32.mxu0 %vm94_vm0, %v1378_v3  ;;  %v1381_v11 = vmax.f32 %v1299_v5, 0.0 }
 0x20a   :  { %v4019_v8 = vpop.f32.mrf.mxu1  ;;  %4116 = vmatmul.mubr.msk.f32.gmra.mxu0 %vm94_vm0, %v1379_v4 }
 0x20b   :  { %v1380_v9 = vmax.f32 %v1294_v7, 0.0  ;;  %v1309_v12 = vadd.f32 %v4019_v8, %v4979_v17 }
 0x20c   :  { %v1303_v13 = vpop.f32.mrf.mxu1 }
 0x20d   :  { %v1304_v14 = vadd.f32 %v4979_v17, %v1303_v13  ;;  %4118 = vmatprep.mubr.msk.f32.mxu0 %vm94_vm0, %v1380_v9  ;;  %v1383_v10 = vmax.f32 %v1309_v12, 0.0 }
 0x20e   :  { %v4022_v15 = vpop.f32.mrf.mxu1  ;;  %4119 = vmatmul.mubr.msk.f32.gmra.mxu0 %vm94_vm0, %v1381_v11 }
 0x20f   :  { %v1382_v16 = vmax.f32 %v1304_v14, 0.0  ;;  %v1319_v18 = vadd.f32 %v4022_v15, %v4979_v17 }
 0x210   :  { %v1313_v19 = vpop.f32.mrf.mxu1 }
 0x211   :  { %v1314_v20 = vadd.f32 %v4979_v17, %v1313_v19  ;;  %4121 = vmatprep.mubr.msk.f32.mxu0 %vm94_vm0, %v1382_v16  ;;  %v1385_v22 = vmax.f32 %v1319_v18, 0.0 }
 0x212   :  { %4122 = vmatmul.mubr.msk.f32.gmra.mxu0 %vm94_vm0, %v1383_v10 }
 0x213   :  { %v1384_v21 = vmax.f32 %v1314_v20, 0.0 }
 0x215   :  { %4124 = vmatprep.mubr.msk.f32.mxu0 %vm94_vm0, %v1384_v21 }
 0x216   :  { %4125 = vmatmul.mubr.msk.f32.gmra.mxu0 %vm94_vm0, %v1385_v22 }
 0x25a   :  { %v4033_v24 = vpop.f32.mrf.mxu0 }
 0x25b   :  { %v1660_v25 = vadd.f32 %v4033_v24, %v5118_v23 }
 0x25c   :  { %v1654_v26 = vpop.f32.mrf.mxu0 }
 0x25d   :  { %v1655_v17 = vadd.f32 %v5118_v23, %v1654_v26  ;;  %v1974_v29 = vmax.f32 %v1660_v25, 0.0 }
 0x25e   :  { %v4036_v27 = vpop.f32.mrf.mxu0 }
 0x25f   :  { %v1973_v28 = vmax.f32 %v1655_v17, 0.0  ;;  %v1670_v30 = vadd.f32 %v4036_v27, %v5118_v23 }
 0x260   :  { %v1664_v31 = vpop.f32.mrf.mxu0 }
 0x261   :  { %v1665_v32 = vadd.f32 %v5118_v23, %v1664_v31  ;;  %4135 = vmatprep.mubr.msk.f32.mxu1 %vm94_vm0, %v1973_v28  ;;  %v1976_v35 = vmax.f32 %v1670_v30, 0.0 }
 0x262   :  { %v4039_v33 = vpop.f32.mrf.mxu0  ;;  %4136 = vmatmul.mubr.msk.f32.vlgmr.msra.gmra.mxu1 %vm94_vm0, %v1974_v29 }
 0x263   :  { %v1975_v34 = vmax.f32 %v1665_v32, 0.0  ;;  %v1680_v36 = vadd.f32 %v4039_v33, %v5118_v23 }
 0x264   :  { %v1674_v37 = vpop.f32.mrf.mxu0 }
 0x265   :  { %v1675_v38 = vadd.f32 %v5118_v23, %v1674_v37  ;;  %4138 = vmatprep.mubr.msk.f32.mxu1 %vm94_vm0, %v1975_v34  ;;  %v1978_v41 = vmax.f32 %v1680_v36, 0.0 }
 0x266   :  { %v4042_v39 = vpop.f32.mrf.mxu0  ;;  %4139 = vmatmul.mubr.msk.f32.gmra.mxu1 %vm94_vm0, %v1976_v35 }
 0x267   :  { %v1977_v40 = vmax.f32 %v1675_v38, 0.0  ;;  %v1690_v42 = vadd.f32 %v4042_v39, %v5118_v23 }
 0x268   :  { %v1684_v43 = vpop.f32.mrf.mxu0 }
 0x269   :  { %v1685_v44 = vadd.f32 %v5118_v23, %v1684_v43  ;;  %4141 = vmatprep.mubr.msk.f32.mxu1 %vm94_vm0, %v1977_v40  ;;  %v1980_v47 = vmax.f32 %v1690_v42, 0.0 }
 0x26a   :  { %v4045_v45 = vpop.f32.mrf.mxu0  ;;  %4142 = vmatmul.mubr.msk.f32.gmra.mxu1 %vm94_vm0, %v1978_v41 }
 0x26b   :  { %v1979_v46 = vmax.f32 %v1685_v44, 0.0  ;;  %v1700_v48 = vadd.f32 %v4045_v45, %v5118_v23 }
 0x26c   :  { %v1694_v49 = vpop.f32.mrf.mxu0 }
 0x26d   :  { %v1695_v50 = vadd.f32 %v5118_v23, %v1694_v49  ;;  %4144 = vmatprep.mubr.msk.f32.mxu1 %vm94_vm0, %v1979_v46  ;;  %v1982_v53 = vmax.f32 %v1700_v48, 0.0 }
 0x26e   :  { %v4048_v51 = vpop.f32.mrf.mxu0  ;;  %4145 = vmatmul.mubr.msk.f32.gmra.mxu1 %vm94_vm0, %v1980_v47 }
 0x26f   :  { %v1981_v52 = vmax.f32 %v1695_v50, 0.0  ;;  %v1710_v54 = vadd.f32 %v4048_v51, %v5118_v23 }
 0x270   :  { %v1704_v55 = vpop.f32.mrf.mxu0 }
 0x271   :  { %v1705_v56 = vadd.f32 %v5118_v23, %v1704_v55  ;;  %4147 = vmatprep.mubr.msk.f32.mxu1 %vm94_vm0, %v1981_v52  ;;  %v1984_v59 = vmax.f32 %v1710_v54, 0.0 }
 0x272   :  { %v4051_v57 = vpop.f32.mrf.mxu0  ;;  %4148 = vmatmul.mubr.msk.f32.gmra.mxu1 %vm94_vm0, %v1982_v53 }
 0x273   :  { %v1983_v58 = vmax.f32 %v1705_v56, 0.0  ;;  %v1720_v60 = vadd.f32 %v4051_v57, %v5118_v23 }
 0x274   :  { %v1714_v61 = vpop.f32.mrf.mxu0 }
 0x275   :  { %v1715_v62 = vadd.f32 %v5118_v23, %v1714_v61  ;;  %4150 = vmatprep.mubr.msk.f32.mxu1 %vm94_vm0, %v1983_v58  ;;  %v1986_v1 = vmax.f32 %v1720_v60, 0.0 }
 0x276   :  { %v4054_v63 = vpop.f32.mrf.mxu0  ;;  %4151 = vmatmul.mubr.msk.f32.gmra.mxu1 %vm94_vm0, %v1984_v59 }
 0x277   :  { %v1985_v0 = vmax.f32 %v1715_v62, 0.0  ;;  %v1730_v2 = vadd.f32 %v4054_v63, %v5118_v23 }
 0x278   :  { %v1724_v3 = vpop.f32.mrf.mxu0 }
 0x279   :  { %v1725_v4 = vadd.f32 %v5118_v23, %v1724_v3  ;;  %4153 = vmatprep.mubr.msk.f32.mxu1 %vm94_vm0, %v1985_v0  ;;  %v1988_v7 = vmax.f32 %v1730_v2, 0.0 }
 0x27a   :  { %v4057_v5 = vpop.f32.mrf.mxu0  ;;  %4154 = vmatmul.mubr.msk.f32.gmra.mxu1 %vm94_vm0, %v1986_v1 }
 0x27b   :  { %v1987_v6 = vmax.f32 %v1725_v4, 0.0  ;;  %v1740_v8 = vadd.f32 %v4057_v5, %v5118_v23 }
 0x27c   :  { %v1734_v9 = vpop.f32.mrf.mxu0 }
 0x27d   :  { %v1735_v11 = vadd.f32 %v5118_v23, %v1734_v9  ;;  %4156 = vmatprep.mubr.msk.f32.mxu1 %vm94_vm0, %v1987_v6  ;;  %v1990_v14 = vmax.f32 %v1740_v8, 0.0 }
 0x27e   :  { %v4060_v12 = vpop.f32.mrf.mxu0  ;;  %4157 = vmatmul.mubr.msk.f32.gmra.mxu1 %vm94_vm0, %v1988_v7 }
 0x27f   :  { %v1989_v13 = vmax.f32 %v1735_v11, 0.0  ;;  %v1750_v15 = vadd.f32 %v4060_v12, %v5118_v23 }
 0x280   :  { %v1744_v16 = vpop.f32.mrf.mxu0 }
 0x281   :  { %v1745_v10 = vadd.f32 %v5118_v23, %v1744_v16  ;;  %4159 = vmatprep.mubr.msk.f32.mxu1 %vm94_vm0, %v1989_v13  ;;  %v1992_v20 = vmax.f32 %v1750_v15, 0.0 }
 0x282   :  { %v4063_v18 = vpop.f32.mrf.mxu0  ;;  %4160 = vmatmul.mubr.msk.f32.gmra.mxu1 %vm94_vm0, %v1990_v14 }
 0x283   :  { %v1991_v19 = vmax.f32 %v1745_v10, 0.0  ;;  %v1760_v21 = vadd.f32 %v4063_v18, %v5118_v23 }
 0x284   :  { %v1754_v22 = vpop.f32.mrf.mxu0 }
 0x285   :  { %v1755_v24 = vadd.f32 %v5118_v23, %v1754_v22  ;;  %4162 = vmatprep.mubr.msk.f32.mxu1 %vm94_vm0, %v1991_v19  ;;  %v1994_v17 = vmax.f32 %v1760_v21, 0.0 }
 0x286   :  { %v4066_v25 = vpop.f32.mrf.mxu0  ;;  %4163 = vmatmul.mubr.msk.f32.gmra.mxu1 %vm94_vm0, %v1992_v20 }
 0x287   :  { %v1993_v26 = vmax.f32 %v1755_v24, 0.0  ;;  %v1770_v27 = vadd.f32 %v4066_v25, %v5118_v23 }
 0x288   :  { %v1764_v28 = vpop.f32.mrf.mxu0 }
 0x289   :  { %v1765_v29 = vadd.f32 %v5118_v23, %v1764_v28  ;;  %4165 = vmatprep.mubr.msk.f32.mxu1 %vm94_vm0, %v1993_v26  ;;  %v1996_v32 = vmax.f32 %v1770_v27, 0.0 }
 0x28a   :  { %v4069_v30 = vpop.f32.mrf.mxu0  ;;  %4166 = vmatmul.mubr.msk.f32.gmra.mxu1 %vm94_vm0, %v1994_v17 }
 0x28b   :  { %v1995_v31 = vmax.f32 %v1765_v29, 0.0  ;;  %v1780_v33 = vadd.f32 %v4069_v30, %v5118_v23 }
 0x28c   :  { %v1774_v34 = vpop.f32.mrf.mxu0 }
 0x28d   :  { %v1775_v35 = vadd.f32 %v5118_v23, %v1774_v34  ;;  %4168 = vmatprep.mubr.msk.f32.mxu1 %vm94_vm0, %v1995_v31  ;;  %v1998_v38 = vmax.f32 %v1780_v33, 0.0 }
 0x28e   :  { %v4072_v36 = vpop.f32.mrf.mxu0  ;;  %4169 = vmatmul.mubr.msk.f32.gmra.mxu1 %vm94_vm0, %v1996_v32 }
 0x28f   :  { %v1997_v37 = vmax.f32 %v1775_v35, 0.0  ;;  %v1790_v39 = vadd.f32 %v4072_v36, %v5118_v23 }
 0x290   :  { %v1784_v40 = vpop.f32.mrf.mxu0 }
 0x291   :  { %v1785_v41 = vadd.f32 %v5118_v23, %v1784_v40  ;;  %4171 = vmatprep.mubr.msk.f32.mxu1 %vm94_vm0, %v1997_v37  ;;  %v2000_v44 = vmax.f32 %v1790_v39, 0.0 }
 0x292   :  { %v4075_v42 = vpop.f32.mrf.mxu0  ;;  %4172 = vmatmul.mubr.msk.f32.gmra.mxu1 %vm94_vm0, %v1998_v38 }
 0x293   :  { %v1999_v43 = vmax.f32 %v1785_v41, 0.0  ;;  %v1800_v45 = vadd.f32 %v4075_v42, %v5118_v23 }
 0x294   :  { %v1794_v46 = vpop.f32.mrf.mxu0 }
 0x295   :  { %v1795_v47 = vadd.f32 %v5118_v23, %v1794_v46  ;;  %4174 = vmatprep.mubr.msk.f32.mxu1 %vm94_vm0, %v1999_v43  ;;  %v2002_v50 = vmax.f32 %v1800_v45, 0.0 }
 0x296   :  { %v4078_v48 = vpop.f32.mrf.mxu0  ;;  %4175 = vmatmul.mubr.msk.f32.gmra.mxu1 %vm94_vm0, %v2000_v44 }
 0x297   :  { %v2001_v49 = vmax.f32 %v1795_v47, 0.0  ;;  %v1810_v51 = vadd.f32 %v4078_v48, %v5118_v23 }
 0x298   :  { %v1804_v52 = vpop.f32.mrf.mxu0 }
 0x299   :  { %v1805_v53 = vadd.f32 %v5118_v23, %v1804_v52  ;;  %4177 = vmatprep.mubr.msk.f32.mxu1 %vm94_vm0, %v2001_v49  ;;  %v2004_v56 = vmax.f32 %v1810_v51, 0.0 }
 0x29a   :  { %v4081_v54 = vpop.f32.mrf.mxu0  ;;  %4178 = vmatmul.mubr.msk.f32.gmra.mxu1 %vm94_vm0, %v2002_v50 }
 0x29b   :  { %v2003_v55 = vmax.f32 %v1805_v53, 0.0  ;;  %v1820_v57 = vadd.f32 %v4081_v54, %v5118_v23 }
 0x29c   :  { %v1814_v58 = vpop.f32.mrf.mxu0 }
 0x29d   :  { %v1815_v59 = vadd.f32 %v5118_v23, %v1814_v58  ;;  %4180 = vmatprep.mubr.msk.f32.mxu1 %vm94_vm0, %v2003_v55  ;;  %v2006_v62 = vmax.f32 %v1820_v57, 0.0 }
 0x29e   :  { %v4084_v60 = vpop.f32.mrf.mxu0  ;;  %4181 = vmatmul.mubr.msk.f32.gmra.mxu1 %vm94_vm0, %v2004_v56 }
 0x29f   :  { %v2005_v61 = vmax.f32 %v1815_v59, 0.0  ;;  %v1830_v63 = vadd.f32 %v4084_v60, %v5118_v23 }
 0x2a0   :  { %v1824_v0 = vpop.f32.mrf.mxu0 }
 0x2a1   :  { %v1825_v1 = vadd.f32 %v5118_v23, %v1824_v0  ;;  %4183 = vmatprep.mubr.msk.f32.mxu1 %vm94_vm0, %v2005_v61  ;;  %v2008_v4 = vmax.f32 %v1830_v63, 0.0 }
 0x2a2   :  { %v4087_v2 = vpop.f32.mrf.mxu0  ;;  %4184 = vmatmul.mubr.msk.f32.gmra.mxu1 %vm94_vm0, %v2006_v62 }
 0x2a3   :  { %v2007_v3 = vmax.f32 %v1825_v1, 0.0  ;;  %v1840_v5 = vadd.f32 %v4087_v2, %v5118_v23 }
 0x2a4   :  { %v1834_v6 = vpop.f32.mrf.mxu0 }
 0x2a5   :  { %v1835_v7 = vadd.f32 %v5118_v23, %v1834_v6  ;;  %4186 = vmatprep.mubr.msk.f32.mxu1 %vm94_vm0, %v2007_v3  ;;  %v2010_v11 = vmax.f32 %v1840_v5, 0.0 }
 0x2a6   :  { %v4090_v8 = vpop.f32.mrf.mxu0  ;;  %4187 = vmatmul.mubr.msk.f32.gmra.mxu1 %vm94_vm0, %v2008_v4 }
 0x2a7   :  { %v2009_v9 = vmax.f32 %v1835_v7, 0.0  ;;  %v1850_v12 = vadd.f32 %v4090_v8, %v5118_v23 }
 0x2a8   :  { %v1844_v13 = vpop.f32.mrf.mxu0 }
 0x2a9   :  { %v1845_v14 = vadd.f32 %v5118_v23, %v1844_v13  ;;  %4189 = vmatprep.mubr.msk.f32.mxu1 %vm94_vm0, %v2009_v9  ;;  %v2012_v10 = vmax.f32 %v1850_v12, 0.0 }
 0x2aa   :  { %v4093_v15 = vpop.f32.mrf.mxu0  ;;  %4190 = vmatmul.mubr.msk.f32.gmra.mxu1 %vm94_vm0, %v2010_v11 }
 0x2ab   :  { %v2011_v16 = vmax.f32 %v1845_v14, 0.0  ;;  %v1860_v18 = vadd.f32 %v4093_v15, %v5118_v23 }
 0x2ac   :  { %v1854_v19 = vpop.f32.mrf.mxu0 }
 0x2ad   :  { %v1855_v20 = vadd.f32 %v5118_v23, %v1854_v19  ;;  %4192 = vmatprep.mubr.msk.f32.mxu1 %vm94_vm0, %v2011_v16  ;;  %v2014_v24 = vmax.f32 %v1860_v18, 0.0 }
 0x2ae   :  { %v4096_v21 = vpop.f32.mrf.mxu0  ;;  %4193 = vmatmul.mubr.msk.f32.gmra.mxu1 %vm94_vm0, %v2012_v10 }
 0x2af   :  { %v2013_v22 = vmax.f32 %v1855_v20, 0.0  ;;  %v1870_v25 = vadd.f32 %v4096_v21, %v5118_v23 }
 0x2b0   :  { %v1864_v26 = vpop.f32.mrf.mxu0 }
 0x2b1   :  { %v1865_v17 = vadd.f32 %v5118_v23, %v1864_v26  ;;  %4195 = vmatprep.mubr.msk.f32.mxu1 %vm94_vm0, %v2013_v22  ;;  %v2016_v29 = vmax.f32 %v1870_v25, 0.0 }
 0x2b2   :  { %v4099_v27 = vpop.f32.mrf.mxu0  ;;  %4196 = vmatmul.mubr.msk.f32.gmra.mxu1 %vm94_vm0, %v2014_v24 }
 0x2b3   :  { %v2015_v28 = vmax.f32 %v1865_v17, 0.0  ;;  %v1880_v30 = vadd.f32 %v4099_v27, %v5118_v23  ;;  %v5251_v17 = vld [vmem:[%s5836_s4 + $0x3] ss:$0 sm:$0xff]  ;;  %s4512_s4 = smov [#allocation2]  }
 0x2b4   :  { %v1874_v31 = vpop.f32.mrf.mxu0  ;;  %s3268_s27 = sshll.u32 %s4512_s4, 4  ;;  %s3269_s27 = int_to_ptr.vmem [resolvable:$true] %s3268_s27 }
 0x2b5   :  { %v1875_v32 = vadd.f32 %v5118_v23, %v1874_v31  ;;  %4198 = vmatprep.mubr.msk.f32.mxu1 %vm94_vm0, %v2015_v28  ;;  %v2018_v35 = vmax.f32 %v1880_v30, 0.0  ;;  %s4490_s28 = scalar_lea.vmem %s3269_s27, 8192  ;;  %p4495_p1 = scmp.lt.s32.totalorder %s3269_s27, %s3269_s27 }
 0x2b6   :  { %v4102_v33 = vpop.f32.mrf.mxu0  ;;  %4199 = vmatmul.mubr.msk.f32.gmra.mxu1 %vm94_vm0, %v2016_v29  ;;  %p4491_p0 = scmp.ne.s32.totalorder %s3269_s27, %s4490_s28  ;;  %p4496_p2 = scmp.lt.s32.totalorder %s4490_s28, %s4490_s28 }
 0x2b7   :  { %v2017_v34 = vmax.f32 %v1875_v32, 0.0  ;;  %v1890_v36 = vadd.f32 %v4102_v33, %v5118_v23 }
 0x2b8   :  { %v1884_v37 = vpop.f32.mrf.mxu0  ;;  %p4497_p3 = por %p4496_p2, %p4495_p1 }
 0x2b9   :  { %v1885_v38 = vadd.f32 %v5118_v23, %v1884_v37  ;;  %4201 = vmatprep.mubr.msk.f32.mxu1 %vm94_vm0, %v2017_v34  ;;  %v2020_v41 = vmax.f32 %v1890_v36, 0.0 }
 0x2ba   :  { %v4105_v39 = vpop.f32.mrf.mxu0  ;;  %4202 = vmatmul.mubr.msk.f32.gmra.mxu1 %vm94_vm0, %v2018_v35  ;;  %p4498_p4 = pnand %p4497_p3, %p4491_p0 }
 0x2bb   :  { %v2019_v40 = vmax.f32 %v1885_v38, 0.0  ;;  %v1900_v42 = vadd.f32 %v4105_v39, %v5118_v23 }
 0x2bc   :  { %v1894_v43 = vpop.f32.mrf.mxu0 }
 0x2bd   :  { %v1895_v44 = vadd.f32 %v5118_v23, %v1894_v43  ;;  %4204 = vmatprep.mubr.msk.f32.mxu1 %vm94_vm0, %v2019_v40  ;;  %v2022_v47 = vmax.f32 %v1900_v42, 0.0 }
 0x2be   :  { %v4108_v45 = vpop.f32.mrf.mxu0  ;;  %4205 = vmatmul.mubr.msk.f32.gmra.mxu1 %vm94_vm0, %v2020_v41 }
 0x2bf   :  { %v2021_v46 = vmax.f32 %v1895_v44, 0.0  ;;  %v1910_v48 = vadd.f32 %v4108_v45, %v5118_v23 }
 0x2c0   :  { %v1904_v49 = vpop.f32.mrf.mxu0 }
 0x2c1   :  { %v1905_v50 = vadd.f32 %v5118_v23, %v1904_v49  ;;  %4207 = vmatprep.mubr.msk.f32.mxu1 %vm94_vm0, %v2021_v46  ;;  %v2024_v53 = vmax.f32 %v1910_v48, 0.0 }
 0x2c2   :  { %v4111_v51 = vpop.f32.mrf.mxu0  ;;  %4208 = vmatmul.mubr.msk.f32.gmra.mxu1 %vm94_vm0, %v2022_v47 }
 0x2c3   :  { %v2023_v52 = vmax.f32 %v1905_v50, 0.0  ;;  %v1920_v54 = vadd.f32 %v4111_v51, %v5118_v23 }
 0x2c4   :  { %v1914_v55 = vpop.f32.mrf.mxu0 }
 0x2c5   :  { %v1915_v56 = vadd.f32 %v5118_v23, %v1914_v55  ;;  %4210 = vmatprep.mubr.msk.f32.mxu1 %vm94_vm0, %v2023_v52  ;;  %v2026_v59 = vmax.f32 %v1920_v54, 0.0 }
 0x2c6   :  { %v4114_v57 = vpop.f32.mrf.mxu0  ;;  %4211 = vmatmul.mubr.msk.f32.gmra.mxu1 %vm94_vm0, %v2024_v53 }
 0x2c7   :  { %v2025_v58 = vmax.f32 %v1915_v56, 0.0  ;;  %v1930_v60 = vadd.f32 %v4114_v57, %v5118_v23 }
 0x2c8   :  { %v1924_v61 = vpop.f32.mrf.mxu0 }
 0x2c9   :  { %v1925_v62 = vadd.f32 %v5118_v23, %v1924_v61  ;;  %4213 = vmatprep.mubr.msk.f32.mxu1 %vm94_vm0, %v2025_v58  ;;  %v2028_v1 = vmax.f32 %v1930_v60, 0.0 }
 0x2ca   :  { %v4117_v63 = vpop.f32.mrf.mxu0  ;;  %4214 = vmatmul.mubr.msk.f32.gmra.mxu1 %vm94_vm0, %v2026_v59 }
 0x2cb   :  { %v2027_v0 = vmax.f32 %v1925_v62, 0.0  ;;  %v1940_v2 = vadd.f32 %v4117_v63, %v5118_v23 }
 0x2cc   :  { %v1934_v3 = vpop.f32.mrf.mxu0 }
 0x2cd   :  { %v1935_v4 = vadd.f32 %v5118_v23, %v1934_v3  ;;  %4216 = vmatprep.mubr.msk.f32.mxu1 %vm94_vm0, %v2027_v0  ;;  %v2030_v7 = vmax.f32 %v1940_v2, 0.0 }
 0x2ce   :  { %v4120_v5 = vpop.f32.mrf.mxu0  ;;  %4217 = vmatmul.mubr.msk.f32.gmra.mxu1 %vm94_vm0, %v2028_v1 }
 0x2cf   :  { %v2029_v6 = vmax.f32 %v1935_v4, 0.0  ;;  %v1950_v8 = vadd.f32 %v4120_v5, %v5118_v23 }
 0x2d0   :  { %v1944_v9 = vpop.f32.mrf.mxu0 }
 0x2d1   :  { %v1945_v11 = vadd.f32 %v5118_v23, %v1944_v9  ;;  %4219 = vmatprep.mubr.msk.f32.mxu1 %vm94_vm0, %v2029_v6  ;;  %v2032_v14 = vmax.f32 %v1950_v8, 0.0 }
 0x2d2   :  { %v4123_v12 = vpop.f32.mrf.mxu0  ;;  %4220 = vmatmul.mubr.msk.f32.gmra.mxu1 %vm94_vm0, %v2030_v7 }
 0x2d3   :  { %v2031_v13 = vmax.f32 %v1945_v11, 0.0  ;;  %v1960_v15 = vadd.f32 %v4123_v12, %v5118_v23 }
 0x2d4   :  { %v1954_v16 = vpop.f32.mrf.mxu0 }
 0x2d5   :  { %v1955_v10 = vadd.f32 %v5118_v23, %v1954_v16  ;;  %4222 = vmatprep.mubr.msk.f32.mxu1 %vm94_vm0, %v2031_v13  ;;  %v2034_v20 = vmax.f32 %v1960_v15, 0.0 }
 0x2d6   :  { %v4126_v18 = vpop.f32.mrf.mxu0  ;;  %4223 = vmatmul.mubr.msk.f32.gmra.mxu1 %vm94_vm0, %v2032_v14 }
 0x2d7   :  { %v2033_v19 = vmax.f32 %v1955_v10, 0.0  ;;  %v1970_v21 = vadd.f32 %v4126_v18, %v5118_v23 }
 0x2d8   :  { %v1964_v22 = vpop.f32.mrf.mxu0 }
 0x2d9   :  { %v1965_v24 = vadd.f32 %v5118_v23, %v1964_v22  ;;  %4225 = vmatprep.mubr.msk.f32.mxu1 %vm94_vm0, %v2033_v19  ;;  %v2036_v26 = vmax.f32 %v1970_v21, 0.0 }
 0x2da   :  { %4226 = vmatmul.mubr.msk.f32.gmra.mxu1 %vm94_vm0, %v2034_v20 }
 0x2db   :  { %v2035_v25 = vmax.f32 %v1965_v24, 0.0 }
 0x2dd   :  { %4228 = vmatprep.mubr.msk.f32.mxu1 %vm94_vm0, %v2035_v25 }
 0x2de   :  { %4229 = vmatmul.mubr.msk.f32.gmra.mxu1 %vm94_vm0, %v2036_v26 }
 0x322   :  { %v4137_v27 = vpop.f32.mrf.mxu1 }
 0x323   :  { %v5254_v28 = vadd.f32 %v4137_v27, %v5251_v17 }
 0x324   :  { %v2304_v23 = vpop.f32.mrf.mxu1 }
 0x325   :  { %2625 = vmax.xlane.f32.xlu0 %v5254_v28  ;;  %v5258_v30 = vadd.f32 %v5251_v17, %v2304_v23 }
 0x326   :  { %v4140_v29 = vpop.f32.mrf.mxu1 }
 0x327   :  { %v5261_v31 = vadd.f32 %v4140_v29, %v5251_v17 }
 0x328   :  { %v2314_v32 = vpop.f32.mrf.mxu1 }
 0x329   :  { %2629 = vmax.xlane.f32.xlu1 %v5261_v31  ;;  %2623 = vmax.xlane.f32.xlu0 %v5258_v30  ;;  %v5266_v34 = vadd.f32 %v5251_v17, %v2314_v32 }
 0x32a   :  { %v4143_v33 = vpop.f32.mrf.mxu1 }
 0x32b   :  { %v5273_v38 = vadd.f32 %v4143_v33, %v5251_v17 }
 0x32c   :  { %v2324_v35 = vpop.f32.mrf.mxu1 }
 0x32d   :  { %v5269_v36 = vadd.f32 %v5251_v17, %v2324_v35  ;;  %2627 = vmax.xlane.f32.xlu1 %v5266_v34 }
 0x32e   :  { %v4146_v37 = vpop.f32.mrf.mxu1 }
 0x32f   :  { %2631 = vmax.xlane.f32.xlu0 %v5269_v36  ;;  %v5281_v42 = vadd.f32 %v4146_v37, %v5251_v17 }
 0x330   :  { %v2334_v39 = vpop.f32.mrf.mxu1 }
 0x331   :  { %v5277_v40 = vadd.f32 %v5251_v17, %v2334_v39  ;;  %2633 = vmax.xlane.f32.xlu1 %v5273_v38 }
 0x332   :  { %v4149_v41 = vpop.f32.mrf.mxu1 }
 0x333   :  { %2635 = vmax.xlane.f32.xlu0 %v5277_v40  ;;  %v5289_v46 = vadd.f32 %v4149_v41, %v5251_v17 }
 0x334   :  { %v2344_v43 = vpop.f32.mrf.mxu1 }
 0x335   :  { %v5285_v44 = vadd.f32 %v5251_v17, %v2344_v43  ;;  %2637 = vmax.xlane.f32.xlu1 %v5281_v42 }
 0x336   :  { %v4152_v45 = vpop.f32.mrf.mxu1 }
 0x337   :  { %2639 = vmax.xlane.f32.xlu0 %v5285_v44  ;;  %v5297_v50 = vadd.f32 %v4152_v45, %v5251_v17 }
 0x338   :  { %v2354_v47 = vpop.f32.mrf.mxu1 }
 0x339   :  { %v5293_v48 = vadd.f32 %v5251_v17, %v2354_v47  ;;  %2641 = vmax.xlane.f32.xlu1 %v5289_v46 }
 0x33a   :  { %v4155_v49 = vpop.f32.mrf.mxu1 }
 0x33b   :  { %2643 = vmax.xlane.f32.xlu0 %v5293_v48  ;;  %v5305_v54 = vadd.f32 %v4155_v49, %v5251_v17 }
 0x33c   :  { %v2364_v51 = vpop.f32.mrf.mxu1 }
 0x33d   :  { %v5301_v52 = vadd.f32 %v5251_v17, %v2364_v51  ;;  %2645 = vmax.xlane.f32.xlu1 %v5297_v50 }
 0x33e   :  { %v4158_v53 = vpop.f32.mrf.mxu1 }
 0x33f   :  { %2647 = vmax.xlane.f32.xlu0 %v5301_v52  ;;  %v5313_v58 = vadd.f32 %v4158_v53, %v5251_v17 }
 0x340   :  { %v2374_v55 = vpop.f32.mrf.mxu1 }
 0x341   :  { %v5309_v56 = vadd.f32 %v5251_v17, %v2374_v55  ;;  %2649 = vmax.xlane.f32.xlu1 %v5305_v54 }
 0x342   :  { %v4161_v57 = vpop.f32.mrf.mxu1 }
 0x343   :  { %2651 = vmax.xlane.f32.xlu0 %v5309_v56  ;;  %v5321_v62 = vadd.f32 %v4161_v57, %v5251_v17 }
 0x344   :  { %v2384_v59 = vpop.f32.mrf.mxu1 }
 0x345   :  { %v5317_v60 = vadd.f32 %v5251_v17, %v2384_v59  ;;  %2653 = vmax.xlane.f32.xlu1 %v5313_v58 }
 0x346   :  { %v4164_v61 = vpop.f32.mrf.mxu1 }
 0x347   :  { %2655 = vmax.xlane.f32.xlu0 %v5317_v60  ;;  %v5329_v2 = vadd.f32 %v4164_v61, %v5251_v17 }
 0x348   :  { %v2394_v63 = vpop.f32.mrf.mxu1 }
 0x349   :  { %v5325_v0 = vadd.f32 %v5251_v17, %v2394_v63  ;;  %2657 = vmax.xlane.f32.xlu1 %v5321_v62 }
 0x34a   :  { %v4167_v1 = vpop.f32.mrf.mxu1 }
 0x34b   :  { %2659 = vmax.xlane.f32.xlu0 %v5325_v0  ;;  %v5337_v6 = vadd.f32 %v4167_v1, %v5251_v17 }
 0x34c   :  { %v2404_v3 = vpop.f32.mrf.mxu1 }
 0x34d   :  { %v5333_v4 = vadd.f32 %v5251_v17, %v2404_v3  ;;  %2661 = vmax.xlane.f32.xlu1 %v5329_v2 }
 0x34e   :  { %v4170_v5 = vpop.f32.mrf.mxu1 }
 0x34f   :  { %2663 = vmax.xlane.f32.xlu0 %v5333_v4  ;;  %v5345_v11 = vadd.f32 %v4170_v5, %v5251_v17 }
 0x350   :  { %v2414_v7 = vpop.f32.mrf.mxu1 }
 0x351   :  { %v5341_v8 = vadd.f32 %v5251_v17, %v2414_v7  ;;  %2665 = vmax.xlane.f32.xlu1 %v5337_v6 }
 0x352   :  { %v4173_v9 = vpop.f32.mrf.mxu1 }
 0x353   :  { %2667 = vmax.xlane.f32.xlu0 %v5341_v8  ;;  %v5353_v15 = vadd.f32 %v4173_v9, %v5251_v17 }
 0x354   :  { %v2424_v12 = vpop.f32.mrf.mxu1 }
 0x355   :  { %v5349_v13 = vadd.f32 %v5251_v17, %v2424_v12  ;;  %2669 = vmax.xlane.f32.xlu1 %v5345_v11 }
 0x356   :  { %v4176_v14 = vpop.f32.mrf.mxu1 }
 0x357   :  { %2671 = vmax.xlane.f32.xlu0 %v5349_v13  ;;  %v5361_v19 = vadd.f32 %v4176_v14, %v5251_v17 }
 0x358   :  { %v2434_v16 = vpop.f32.mrf.mxu1 }
 0x359   :  { %v5357_v10 = vadd.f32 %v5251_v17, %v2434_v16  ;;  %2673 = vmax.xlane.f32.xlu1 %v5353_v15 }
 0x35a   :  { %v4179_v18 = vpop.f32.mrf.mxu1 }
 0x35b   :  { %2675 = vmax.xlane.f32.xlu0 %v5357_v10  ;;  %v5369_v24 = vadd.f32 %v4179_v18, %v5251_v17 }
 0x35c   :  { %v2444_v20 = vpop.f32.mrf.mxu1 }
 0x35d   :  { %v5365_v21 = vadd.f32 %v5251_v17, %v2444_v20  ;;  %2677 = vmax.xlane.f32.xlu1 %v5361_v19 }
 0x35e   :  { %v4182_v22 = vpop.f32.mrf.mxu1 }
 0x35f   :  { %2679 = vmax.xlane.f32.xlu0 %v5365_v21  ;;  %v5377_v23 = vadd.f32 %v4182_v22, %v5251_v17 }
 0x360   :  { %v2454_v25 = vpop.f32.mrf.mxu1 }
 0x361   :  { %v5373_v26 = vadd.f32 %v5251_v17, %v2454_v25  ;;  %2681 = vmax.xlane.f32.xlu1 %v5369_v24 }
 0x362   :  { %v4185_v27 = vpop.f32.mrf.mxu1 }
 0x363   :  { %2683 = vmax.xlane.f32.xlu0 %v5373_v26  ;;  %v5385_v35 = vadd.f32 %v4185_v27, %v5251_v17 }
 0x364   :  { %v2464_v29 = vpop.f32.mrf.mxu1 }
 0x365   :  { %v5381_v32 = vadd.f32 %v5251_v17, %v2464_v29  ;;  %2685 = vmax.xlane.f32.xlu1 %v5377_v23 }
 0x366   :  { %v4188_v33 = vpop.f32.mrf.mxu1 }
 0x367   :  { %2687 = vmax.xlane.f32.xlu0 %v5381_v32  ;;  %v5393_v43 = vadd.f32 %v4188_v33, %v5251_v17 }
 0x368   :  { %v2474_v37 = vpop.f32.mrf.mxu1 }
 0x369   :  { %v5389_v39 = vadd.f32 %v5251_v17, %v2474_v37  ;;  %2689 = vmax.xlane.f32.xlu1 %v5385_v35 }
 0x36a   :  { %v4191_v41 = vpop.f32.mrf.mxu1 }
 0x36b   :  { %2691 = vmax.xlane.f32.xlu0 %v5389_v39  ;;  %v5401_v51 = vadd.f32 %v4191_v41, %v5251_v17 }
 0x36c   :  { %v2484_v45 = vpop.f32.mrf.mxu1 }
 0x36d   :  { %v5397_v47 = vadd.f32 %v5251_v17, %v2484_v45  ;;  %2693 = vmax.xlane.f32.xlu1 %v5393_v43 }
 0x36e   :  { %v4194_v49 = vpop.f32.mrf.mxu1 }
 0x36f   :  { %2695 = vmax.xlane.f32.xlu0 %v5397_v47  ;;  %v5409_v59 = vadd.f32 %v4194_v49, %v5251_v17 }
 0x370   :  { %v2494_v53 = vpop.f32.mrf.mxu1 }
 0x371   :  { %v5405_v55 = vadd.f32 %v5251_v17, %v2494_v53  ;;  %2697 = vmax.xlane.f32.xlu1 %v5401_v51 }
 0x372   :  { %v4197_v57 = vpop.f32.mrf.mxu1 }
 0x373   :  { %2699 = vmax.xlane.f32.xlu0 %v5405_v55  ;;  %v5417_v3 = vadd.f32 %v4197_v57, %v5251_v17 }
 0x374   :  { %v2504_v61 = vpop.f32.mrf.mxu1 }
 0x375   :  { %v5413_v63 = vadd.f32 %v5251_v17, %v2504_v61  ;;  %2701 = vmax.xlane.f32.xlu1 %v5409_v59 }
 0x376   :  { %v4200_v1 = vpop.f32.mrf.mxu1 }
 0x377   :  { %2703 = vmax.xlane.f32.xlu0 %v5413_v63  ;;  %v5425_v12 = vadd.f32 %v4200_v1, %v5251_v17 }
 0x378   :  { %v2514_v5 = vpop.f32.mrf.mxu1 }
 0x379   :  { %v5421_v7 = vadd.f32 %v5251_v17, %v2514_v5  ;;  %2705 = vmax.xlane.f32.xlu1 %v5417_v3 }
 0x37a   :  { %v4203_v9 = vpop.f32.mrf.mxu1 }
 0x37b   :  { %2707 = vmax.xlane.f32.xlu0 %v5421_v7  ;;  %v5433_v20 = vadd.f32 %v4203_v9, %v5251_v17 }
 0x37c   :  { %v2524_v14 = vpop.f32.mrf.mxu1 }
 0x37d   :  { %v5429_v16 = vadd.f32 %v5251_v17, %v2524_v14  ;;  %2709 = vmax.xlane.f32.xlu1 %v5425_v12 }
 0x37e   :  { %v4206_v18 = vpop.f32.mrf.mxu1 }
 0x37f   :  { %2711 = vmax.xlane.f32.xlu0 %v5429_v16  ;;  %v5441_v29 = vadd.f32 %v4206_v18, %v5251_v17 }
 0x380   :  { %v2534_v22 = vpop.f32.mrf.mxu1 }
 0x381   :  { %v5437_v25 = vadd.f32 %v5251_v17, %v2534_v22  ;;  %2713 = vmax.xlane.f32.xlu1 %v5433_v20 }
 0x382   :  { %v4209_v27 = vpop.f32.mrf.mxu1 }
 0x383   :  { %2715 = vmax.xlane.f32.xlu0 %v5437_v25  ;;  %v5449_v45 = vadd.f32 %v4209_v27, %v5251_v17 }
 0x384   :  { %v2544_v33 = vpop.f32.mrf.mxu1 }
 0x385   :  { %v5445_v37 = vadd.f32 %v5251_v17, %v2544_v33  ;;  %2717 = vmax.xlane.f32.xlu1 %v5441_v29 }
 0x386   :  { %v4212_v41 = vpop.f32.mrf.mxu1 }
 0x387   :  { %2719 = vmax.xlane.f32.xlu0 %v5445_v37  ;;  %v5457_v61 = vadd.f32 %v4212_v41, %v5251_v17 }
 0x388   :  { %v2554_v49 = vpop.f32.mrf.mxu1 }
 0x389   :  { %v5453_v53 = vadd.f32 %v5251_v17, %v2554_v49  ;;  %2721 = vmax.xlane.f32.xlu1 %v5449_v45  ;;  %5865 = vst [vmem:[#allocation6_spill] sm:$0xff] %v5457_v61 }
 0x38a   :  { %v4215_v57 = vpop.f32.mrf.mxu1 }
 0x38b   :  { %5864 = vst [vmem:[#allocation5_spill] sm:$0xff] %v5453_v53  ;;  %2723 = vmax.xlane.f32.xlu0 %v5453_v53  ;;  %v5465_v14 = vadd.f32 %v4215_v57, %v5251_v17 }
 0x38c   :  { %v2564_v1 = vpop.f32.mrf.mxu1 }
 0x38d   :  { %v5461_v5 = vadd.f32 %v5251_v17, %v2564_v1  ;;  %2725 = vmax.xlane.f32.xlu1 %v5457_v61  ;;  %5867 = vst [vmem:[#allocation8_spill] sm:$0xff] %v5465_v14 }
 0x38e   :  { %v4218_v9 = vpop.f32.mrf.mxu1 }
 0x38f   :  { %5866 = vst [vmem:[#allocation7_spill] sm:$0xff] %v5461_v5  ;;  %2727 = vmax.xlane.f32.xlu0 %v5461_v5  ;;  %v5473_v33 = vadd.f32 %v4218_v9, %v5251_v17 }
 0x390   :  { %v2574_v18 = vpop.f32.mrf.mxu1 }
 0x391   :  { %v5469_v22 = vadd.f32 %v5251_v17, %v2574_v18  ;;  %2729 = vmax.xlane.f32.xlu1 %v5465_v14  ;;  %5869 = vst [vmem:[#allocation10_spill] sm:$0xff] %v5473_v33 }
 0x392   :  { %v4221_v27 = vpop.f32.mrf.mxu1 }
 0x393   :  { %5868 = vst [vmem:[#allocation9_spill] sm:$0xff] %v5469_v22  ;;  %2731 = vmax.xlane.f32.xlu0 %v5469_v22  ;;  %v5481_v1 = vadd.f32 %v4221_v27, %v5251_v17 }
 0x394   :  { %v2584_v41 = vpop.f32.mrf.mxu1 }
 0x395   :  { %v5477_v49 = vadd.f32 %v5251_v17, %v2584_v41  ;;  %2733 = vmax.xlane.f32.xlu1 %v5473_v33  ;;  %5871 = vst [vmem:[#allocation12_spill] sm:$0xff] %v5481_v1 }
 0x396   :  { %v4224_v57 = vpop.f32.mrf.mxu1 }
 0x397   :  { %5870 = vst [vmem:[#allocation11_spill] sm:$0xff] %v5477_v49  ;;  %2735 = vmax.xlane.f32.xlu0 %v5477_v49  ;;  %v5489_v22 = vadd.f32 %v4224_v57, %v5251_v17 }
 0x398   :  { %v2594_v18 = vpop.f32.mrf.mxu1 }
 0x399   :  { %v5485_v14 = vadd.f32 %v5251_v17, %v2594_v18  ;;  %2737 = vmax.xlane.f32.xlu1 %v5481_v1  ;;  %5873 = vst [vmem:[#allocation14_spill] sm:$0xff] %v5489_v22 }
 0x39a   :  { %v4227_v9 = vpop.f32.mrf.mxu1 }
 0x39b   :  { %5872 = vst [vmem:[#allocation13_spill] sm:$0xff] %v5485_v14  ;;  %2739 = vmax.xlane.f32.xlu0 %v5485_v14  ;;  %v5497_v49 = vadd.f32 %v4227_v9, %v5251_v17 }
 0x39c   :  { %v2604_v41 = vpop.f32.mrf.mxu1 }
 0x39d   :  { %v5493_v33 = vadd.f32 %v5251_v17, %v2604_v41  ;;  %2741 = vmax.xlane.f32.xlu1 %v5489_v22  ;;  %5875 = vst [vmem:[#allocation16_spill] sm:$0xff] %v5497_v49 }
 0x39e   :  { %v4230_v27 = vpop.f32.mrf.mxu1 }
 0x39f   :  { %5874 = vst [vmem:[#allocation15_spill] sm:$0xff] %v5493_v33  ;;  %2743 = vmax.xlane.f32.xlu0 %v5493_v33  ;;  %v5505_v57 = vadd.f32 %v4230_v27, %v5251_v17 }
 0x3a0   :  { %v2614_v18 = vpop.f32.mrf.mxu1 }
 0x3a1   :  { %v5501_v1 = vadd.f32 %v5251_v17, %v2614_v18  ;;  %2745 = vmax.xlane.f32.xlu1 %v5497_v49  ;;  %5877 = vst [vmem:[#allocation18_spill] sm:$0xff] %v5505_v57 }
 0x3a3   :  { %5876 = vst [vmem:[#allocation17_spill] sm:$0xff] %v5501_v1  ;;  %2747 = vmax.xlane.f32.xlu0 %v5501_v1 }
 0x3a5   :  { %2749 = vmax.xlane.f32.xlu1 %v5505_v57 }
 0x3ae   :  { %v2626_v41 = vpop.xlane.xlu0 %2625 }
 0x3af   :  { %v2752_v22 = vsub.f32 %v5254_v28, %v2626_v41 }
 0x3b1   :  { %v2817_v9 = vmul.f32 1.442695, %v2752_v22 }
 0x3b2   :  { %v2630_v14 = vpop.xlane.xlu1 %2629  ;;  %v2624_v5 = vpop.xlane.xlu0 %2623 }
 0x3b3   :  { %4234 = vpow2.f32 %v2817_v9  ;;  %v2754_v33 = vsub.f32 %v5261_v31, %v2630_v14  ;;  %v2751_v18 = vsub.f32 %v5258_v30, %v2624_v5 }
 0x3b5   :  { %v2821_v61 = vmul.f32 1.442695, %v2754_v33  ;;  %v2815_v49 = vmul.f32 1.442695, %v2751_v18 }
 0x3b6   :  { %v2628_v53 = vpop.xlane.xlu1 %2627 }
 0x3b7   :  { %4236 = vpow2.f32 %v2821_v61  ;;  %v2753_v17 = vsub.f32 %v5266_v34, %v2628_v53 }
 0x3b8   :  { %4238 = vpow2.f32 %v2815_v49  ;;  %v2632_v27 = vpop.xlane.xlu0 %2631 }
 0x3b9   :  { %v2819_v57 = vmul.f32 1.442695, %v2753_v17  ;;  %v2755_v1 = vsub.f32 %v5269_v36, %v2632_v27 }
 0x3ba   :  { %v2634_v28 = vpop.xlane.xlu1 %2633 }
 0x3bb   :  { %4240 = vpow2.f32 %v2819_v57  ;;  %v2756_v22 = vsub.f32 %v5273_v38, %v2634_v28  ;;  %v2823_v41 = vmul.f32 1.442695, %v2755_v1 }
 0x3bc   :  { %v2636_v9 = vpop.xlane.xlu0 %2635 }
 0x3bd   :  { %v2825_v31 = vmul.f32 1.442695, %v2756_v22  ;;  %v2757_v30 = vsub.f32 %v5277_v40, %v2636_v9 }
 0x3be   :  { %v2638_v5 = vpop.xlane.xlu1 %2637 }
 0x3bf   :  { %4242 = vpow2.f32 %v2825_v31  ;;  %v2758_v61 = vsub.f32 %v5281_v42, %v2638_v5  ;;  %v2827_v34 = vmul.f32 1.442695, %v2757_v30 }
 0x3c0   :  { %v5517_v14 = vpop.eup %4234  ;;  %4244 = vpow2.f32 %v2823_v41  ;;  %v2640_v53 = vpop.xlane.xlu0 %2639 }
 0x3c1   :  { %v2829_v33 = vmul.f32 1.442695, %v2758_v61  ;;  %v2759_v36 = vsub.f32 %v5285_v44, %v2640_v53  ;;  %2945 = vadd.xlane.f32.xlu1 %v5517_v14 }
 0x3c2   :  { %v2642_v38 = vpop.xlane.xlu1 %2641 }
 0x3c3   :  { %4246 = vpow2.f32 %v2829_v33  ;;  %v2760_v49 = vsub.f32 %v5289_v46, %v2642_v38  ;;  %v2831_v40 = vmul.f32 1.442695, %v2759_v36 }
 0x3c4   :  { %v5522_v1 = vpop.eup %4236  ;;  %4248 = vpow2.f32 %v2827_v34  ;;  %v2644_v57 = vpop.xlane.xlu0 %2643 }
 0x3c5   :  { %v5524_v42 = vpop.eup %4238  ;;  %v2833_v18 = vmul.f32 1.442695, %v2760_v49  ;;  %v2761_v17 = vsub.f32 %v5293_v48, %v2644_v57  ;;  %2949 = vadd.xlane.f32.xlu1 %v5522_v1 }
 0x3c6   :  { %2943 = vadd.xlane.f32.xlu0 %v5524_v42  ;;  %v2646_v44 = vpop.xlane.xlu1 %2645 }
 0x3c7   :  { %4250 = vpow2.f32 %v2833_v18  ;;  %v2762_v27 = vsub.f32 %v5297_v50, %v2646_v44  ;;  %v2835_v46 = vmul.f32 1.442695, %v2761_v17 }
 0x3c8   :  { %v5530_v28 = vpop.eup %4240  ;;  %4252 = vpow2.f32 %v2831_v40  ;;  %v2648_v22 = vpop.xlane.xlu0 %2647 }
 0x3c9   :  { %v2837_v41 = vmul.f32 1.442695, %v2762_v27  ;;  %v2763_v9 = vsub.f32 %v5301_v52, %v2648_v22 }
 0x3ca   :  { %2947 = vadd.xlane.f32.xlu0 %v5530_v28  ;;  %v2650_v31 = vpop.xlane.xlu1 %2649 }
 0x3cb   :  { %4254 = vpow2.f32 %v2837_v41  ;;  %v2764_v48 = vsub.f32 %v5305_v54, %v2650_v31  ;;  %v2839_v5 = vmul.f32 1.442695, %v2763_v9 }
 0x3cc   :  { %v5535_v30 = vpop.eup %4242  ;;  %4256 = vpow2.f32 %v2835_v46  ;;  %v2652_v61 = vpop.xlane.xlu0 %2651 }
 0x3cd   :  { %v5537_v50 = vpop.eup %4244  ;;  %v2841_v34 = vmul.f32 1.442695, %v2764_v48  ;;  %v2765_v53 = vsub.f32 %v5309_v56, %v2652_v61  ;;  %2953 = vadd.xlane.f32.xlu1 %v5535_v30 }
 0x3ce   :  { %2951 = vadd.xlane.f32.xlu0 %v5537_v50  ;;  %v2654_v52 = vpop.xlane.xlu1 %2653 }
 0x3cf   :  { %4258 = vpow2.f32 %v2841_v34  ;;  %v2766_v33 = vsub.f32 %v5313_v58, %v2654_v52  ;;  %v2843_v54 = vmul.f32 1.442695, %v2765_v53 }
 0x3d0   :  { %v5543_v36 = vpop.eup %4246  ;;  %4260 = vpow2.f32 %v2839_v5  ;;  %v2656_v38 = vpop.xlane.xlu0 %2655 }
 0x3d1   :  { %v5545_v49 = vpop.eup %4248  ;;  %v2845_v40 = vmul.f32 1.442695, %v2766_v33  ;;  %v2767_v57 = vsub.f32 %v5317_v60, %v2656_v38  ;;  %2957 = vadd.xlane.f32.xlu1 %v5543_v36 }
 0x3d2   :  { %2955 = vadd.xlane.f32.xlu0 %v5545_v49  ;;  %v2658_v56 = vpop.xlane.xlu1 %2657 }
 0x3d3   :  { %4262 = vpow2.f32 %v2845_v40  ;;  %v2768_v18 = vsub.f32 %v5321_v62, %v2658_v56  ;;  %v2847_v58 = vmul.f32 1.442695, %v2767_v57 }
 0x3d4   :  { %v5551_v17 = vpop.eup %4250  ;;  %4264 = vpow2.f32 %v2843_v54  ;;  %v2660_v44 = vpop.xlane.xlu0 %2659 }
 0x3d5   :  { %v5553_v27 = vpop.eup %4252  ;;  %v2849_v46 = vmul.f32 1.442695, %v2768_v18  ;;  %v2769_v22 = vsub.f32 %v5325_v0, %v2660_v44  ;;  %2961 = vadd.xlane.f32.xlu1 %v5551_v17 }
 0x3d6   :  { %2959 = vadd.xlane.f32.xlu0 %v5553_v27  ;;  %v2662_v60 = vpop.xlane.xlu1 %2661 }
 0x3d7   :  { %4266 = vpow2.f32 %v2849_v46  ;;  %v2770_v41 = vsub.f32 %v5329_v2, %v2662_v60  ;;  %v2851_v62 = vmul.f32 1.442695, %v2769_v22 }
 0x3d8   :  { %v5559_v9 = vpop.eup %4254  ;;  %4268 = vpow2.f32 %v2847_v58  ;;  %v2664_v31 = vpop.xlane.xlu0 %2663 }
 0x3d9   :  { %v5561_v48 = vpop.eup %4256  ;;  %v2853_v5 = vmul.f32 1.442695, %v2770_v41  ;;  %v2771_v61 = vsub.f32 %v5333_v4, %v2664_v31  ;;  %2965 = vadd.xlane.f32.xlu1 %v5559_v9 }
 0x3da   :  { %2963 = vadd.xlane.f32.xlu0 %v5561_v48  ;;  %v2666_v0 = vpop.xlane.xlu1 %2665 }
 0x3db   :  { %4270 = vpow2.f32 %v2853_v5  ;;  %v2772_v34 = vsub.f32 %v5337_v6, %v2666_v0  ;;  %v2855_v2 = vmul.f32 1.442695, %v2771_v61 }
 0x3dc   :  { %v5567_v53 = vpop.eup %4258  ;;  %4272 = vpow2.f32 %v2851_v62  ;;  %v2668_v52 = vpop.xlane.xlu0 %2667 }
 0x3dd   :  { %v5569_v33 = vpop.eup %4260  ;;  %v2857_v54 = vmul.f32 1.442695, %v2772_v34  ;;  %v2773_v38 = vsub.f32 %v5341_v8, %v2668_v52  ;;  %2969 = vadd.xlane.f32.xlu1 %v5567_v53 }
 0x3de   :  { %2967 = vadd.xlane.f32.xlu0 %v5569_v33  ;;  %v2670_v4 = vpop.xlane.xlu1 %2669 }
 0x3df   :  { %4274 = vpow2.f32 %v2857_v54  ;;  %v2774_v40 = vsub.f32 %v5345_v11, %v2670_v4  ;;  %v2859_v6 = vmul.f32 1.442695, %v2773_v38 }
 0x3e0   :  { %v5575_v57 = vpop.eup %4262  ;;  %4276 = vpow2.f32 %v2855_v2  ;;  %v2672_v56 = vpop.xlane.xlu0 %2671 }
 0x3e1   :  { %v5577_v18 = vpop.eup %4264  ;;  %v2861_v58 = vmul.f32 1.442695, %v2774_v40  ;;  %v2775_v44 = vsub.f32 %v5349_v13, %v2672_v56  ;;  %2973 = vadd.xlane.f32.xlu1 %v5575_v57 }
 0x3e2   :  { %2971 = vadd.xlane.f32.xlu0 %v5577_v18  ;;  %v2674_v8 = vpop.xlane.xlu1 %2673 }
 0x3e3   :  { %4278 = vpow2.f32 %v2861_v58  ;;  %v2776_v46 = vsub.f32 %v5353_v15, %v2674_v8  ;;  %v2863_v11 = vmul.f32 1.442695, %v2775_v44 }
 0x3e4   :  { %v5583_v22 = vpop.eup %4266  ;;  %4280 = vpow2.f32 %v2859_v6  ;;  %v2676_v60 = vpop.xlane.xlu0 %2675 }
 0x3e5   :  { %v5585_v41 = vpop.eup %4268  ;;  %v2865_v62 = vmul.f32 1.442695, %v2776_v46  ;;  %v2777_v31 = vsub.f32 %v5357_v10, %v2676_v60  ;;  %2977 = vadd.xlane.f32.xlu1 %v5583_v22 }
 0x3e6   :  { %2975 = vadd.xlane.f32.xlu0 %v5585_v41  ;;  %v2678_v13 = vpop.xlane.xlu1 %2677 }
 0x3e7   :  { %4282 = vpow2.f32 %v2865_v62  ;;  %v2778_v5 = vsub.f32 %v5361_v19, %v2678_v13  ;;  %v2867_v15 = vmul.f32 1.442695, %v2777_v31 }
 0x3e8   :  { %v5591_v61 = vpop.eup %4270  ;;  %4284 = vpow2.f32 %v2863_v11  ;;  %v2680_v0 = vpop.xlane.xlu0 %2679 }
 0x3e9   :  { %v5593_v34 = vpop.eup %4272  ;;  %v2869_v2 = vmul.f32 1.442695, %v2778_v5  ;;  %v2779_v52 = vsub.f32 %v5365_v21, %v2680_v0  ;;  %2981 = vadd.xlane.f32.xlu1 %v5591_v61 }
 0x3ea   :  { %2979 = vadd.xlane.f32.xlu0 %v5593_v34  ;;  %v2682_v10 = vpop.xlane.xlu1 %2681 }
 0x3eb   :  { %4286 = vpow2.f32 %v2869_v2  ;;  %v2780_v54 = vsub.f32 %v5369_v24, %v2682_v10  ;;  %v2871_v19 = vmul.f32 1.442695, %v2779_v52 }
 0x3ec   :  { %v5599_v38 = vpop.eup %4274  ;;  %4288 = vpow2.f32 %v2867_v15  ;;  %v2684_v4 = vpop.xlane.xlu0 %2683 }
 0x3ed   :  { %v5601_v40 = vpop.eup %4276  ;;  %v2873_v6 = vmul.f32 1.442695, %v2780_v54  ;;  %v2781_v56 = vsub.f32 %v5373_v26, %v2684_v4  ;;  %2985 = vadd.xlane.f32.xlu1 %v5599_v38 }
 0x3ee   :  { %2983 = vadd.xlane.f32.xlu0 %v5601_v40  ;;  %v2686_v21 = vpop.xlane.xlu1 %2685 }
 0x3ef   :  { %4290 = vpow2.f32 %v2873_v6  ;;  %v2782_v58 = vsub.f32 %v5377_v23, %v2686_v21  ;;  %v2875_v24 = vmul.f32 1.442695, %v2781_v56 }
 0x3f0   :  { %v5607_v44 = vpop.eup %4278  ;;  %4292 = vpow2.f32 %v2871_v19  ;;  %v2688_v8 = vpop.xlane.xlu0 %2687 }
 0x3f1   :  { %v5609_v46 = vpop.eup %4280  ;;  %v2877_v11 = vmul.f32 1.442695, %v2782_v58  ;;  %v2783_v60 = vsub.f32 %v5381_v32, %v2688_v8  ;;  %2989 = vadd.xlane.f32.xlu1 %v5607_v44 }
 0x3f2   :  { %2987 = vadd.xlane.f32.xlu0 %v5609_v46  ;;  %v2690_v26 = vpop.xlane.xlu1 %2689 }
 0x3f3   :  { %4294 = vpow2.f32 %v2877_v11  ;;  %v2784_v62 = vsub.f32 %v5385_v35, %v2690_v26  ;;  %v2879_v23 = vmul.f32 1.442695, %v2783_v60 }
 0x3f4   :  { %v5615_v31 = vpop.eup %4282  ;;  %4296 = vpow2.f32 %v2875_v24  ;;  %v2692_v13 = vpop.xlane.xlu0 %2691 }
 0x3f5   :  { %v5617_v5 = vpop.eup %4284  ;;  %v2881_v15 = vmul.f32 1.442695, %v2784_v62  ;;  %v2785_v0 = vsub.f32 %v5389_v39, %v2692_v13  ;;  %2993 = vadd.xlane.f32.xlu1 %v5615_v31 }
 0x3f6   :  { %2991 = vadd.xlane.f32.xlu0 %v5617_v5  ;;  %v2694_v32 = vpop.xlane.xlu1 %2693 }
 0x3f7   :  { %4298 = vpow2.f32 %v2881_v15  ;;  %v2786_v2 = vsub.f32 %v5393_v43, %v2694_v32  ;;  %v2883_v35 = vmul.f32 1.442695, %v2785_v0 }
 0x3f8   :  { %v5623_v52 = vpop.eup %4286  ;;  %4300 = vpow2.f32 %v2879_v23  ;;  %v2696_v10 = vpop.xlane.xlu0 %2695 }
 0x3f9   :  { %v5625_v54 = vpop.eup %4288  ;;  %v2885_v19 = vmul.f32 1.442695, %v2786_v2  ;;  %v2787_v4 = vsub.f32 %v5397_v47, %v2696_v10  ;;  %2997 = vadd.xlane.f32.xlu1 %v5623_v52 }
 0x3fa   :  { %2995 = vadd.xlane.f32.xlu0 %v5625_v54  ;;  %v2698_v39 = vpop.xlane.xlu1 %2697 }
 0x3fb   :  { %4302 = vpow2.f32 %v2885_v19  ;;  %v2788_v6 = vsub.f32 %v5401_v51, %v2698_v39  ;;  %v2887_v43 = vmul.f32 1.442695, %v2787_v4 }
 0x3fc   :  { %v5631_v56 = vpop.eup %4290  ;;  %4304 = vpow2.f32 %v2883_v35  ;;  %v2700_v21 = vpop.xlane.xlu0 %2699 }
 0x3fd   :  { %v5633_v58 = vpop.eup %4292  ;;  %v2889_v24 = vmul.f32 1.442695, %v2788_v6  ;;  %v2789_v8 = vsub.f32 %v5405_v55, %v2700_v21  ;;  %3001 = vadd.xlane.f32.xlu1 %v5631_v56 }
 0x3fe   :  { %2999 = vadd.xlane.f32.xlu0 %v5633_v58  ;;  %v2702_v47 = vpop.xlane.xlu1 %2701 }
 0x3ff   :  { %4306 = vpow2.f32 %v2889_v24  ;;  %v2790_v11 = vsub.f32 %v5409_v59, %v2702_v47  ;;  %v2891_v51 = vmul.f32 1.442695, %v2789_v8 }
 0x400   :  { %v5639_v60 = vpop.eup %4294  ;;  %4308 = vpow2.f32 %v2887_v43  ;;  %v2704_v26 = vpop.xlane.xlu0 %2703 }
 0x401   :  { %v5641_v62 = vpop.eup %4296  ;;  %v2893_v23 = vmul.f32 1.442695, %v2790_v11  ;;  %v2791_v13 = vsub.f32 %v5413_v63, %v2704_v26  ;;  %3005 = vadd.xlane.f32.xlu1 %v5639_v60 }
 0x402   :  { %3003 = vadd.xlane.f32.xlu0 %v5641_v62  ;;  %v2706_v55 = vpop.xlane.xlu1 %2705 }
 0x403   :  { %4310 = vpow2.f32 %v2893_v23  ;;  %v2792_v15 = vsub.f32 %v5417_v3, %v2706_v55  ;;  %v2895_v59 = vmul.f32 1.442695, %v2791_v13 }
 0x404   :  { %v5647_v0 = vpop.eup %4298  ;;  %4312 = vpow2.f32 %v2891_v51  ;;  %v2708_v32 = vpop.xlane.xlu0 %2707 }
 0x405   :  { %v5649_v2 = vpop.eup %4300  ;;  %v2897_v35 = vmul.f32 1.442695, %v2792_v15  ;;  %v2793_v10 = vsub.f32 %v5421_v7, %v2708_v32  ;;  %3009 = vadd.xlane.f32.xlu1 %v5647_v0 }
 0x406   :  { %3007 = vadd.xlane.f32.xlu0 %v5649_v2  ;;  %v2710_v63 = vpop.xlane.xlu1 %2709 }
 0x407   :  { %4314 = vpow2.f32 %v2897_v35  ;;  %v2794_v19 = vsub.f32 %v5425_v12, %v2710_v63  ;;  %v2899_v3 = vmul.f32 1.442695, %v2793_v10 }
 0x408   :  { %v5655_v4 = vpop.eup %4302  ;;  %4316 = vpow2.f32 %v2895_v59  ;;  %v2712_v39 = vpop.xlane.xlu0 %2711 }
 0x409   :  { %v5657_v6 = vpop.eup %4304  ;;  %v2901_v43 = vmul.f32 1.442695, %v2794_v19  ;;  %v2795_v21 = vsub.f32 %v5429_v16, %v2712_v39  ;;  %3013 = vadd.xlane.f32.xlu1 %v5655_v4  ;;  %v5878_v39 = vld [vmem:[#allocation5_spill] sm:$0xff] }
 0x40a   :  { %3011 = vadd.xlane.f32.xlu0 %v5657_v6  ;;  %v2714_v7 = vpop.xlane.xlu1 %2713 }
 0x40b   :  { %4318 = vpow2.f32 %v2901_v43  ;;  %v2796_v24 = vsub.f32 %v5433_v20, %v2714_v7  ;;  %v2903_v12 = vmul.f32 1.442695, %v2795_v21  ;;  %v5879_v21 = vld [vmem:[#allocation6_spill] sm:$0xff] }
 0x40c   :  { %v5663_v8 = vpop.eup %4306  ;;  %4320 = vpow2.f32 %v2899_v3  ;;  %v2716_v47 = vpop.xlane.xlu0 %2715 }
 0x40d   :  { %v5665_v11 = vpop.eup %4308  ;;  %v2905_v51 = vmul.f32 1.442695, %v2796_v24  ;;  %v2797_v26 = vsub.f32 %v5437_v25, %v2716_v47  ;;  %3017 = vadd.xlane.f32.xlu1 %v5663_v8 }
 0x40e   :  { %3015 = vadd.xlane.f32.xlu0 %v5665_v11  ;;  %v2718_v16 = vpop.xlane.xlu1 %2717 }
 0x40f   :  { %4322 = vpow2.f32 %v2905_v51  ;;  %v2798_v23 = vsub.f32 %v5441_v29, %v2718_v16  ;;  %v2907_v20 = vmul.f32 1.442695, %v2797_v26  ;;  %v5880_v26 = vld [vmem:[#allocation7_spill] sm:$0xff] }
 0x410   :  { %v5671_v13 = vpop.eup %4310  ;;  %4324 = vpow2.f32 %v2903_v12  ;;  %v2720_v55 = vpop.xlane.xlu0 %2719 }
 0x411   :  { %v5673_v15 = vpop.eup %4312  ;;  %v2909_v59 = vmul.f32 1.442695, %v2798_v23  ;;  %v2799_v32 = vsub.f32 %v5445_v37, %v2720_v55  ;;  %3021 = vadd.xlane.f32.xlu1 %v5671_v13 }
 0x412   :  { %3019 = vadd.xlane.f32.xlu0 %v5673_v15  ;;  %v2722_v25 = vpop.xlane.xlu1 %2721 }
 0x413   :  { %4326 = vpow2.f32 %v2909_v59  ;;  %v2800_v35 = vsub.f32 %v5449_v45, %v2722_v25  ;;  %v2911_v29 = vmul.f32 1.442695, %v2799_v32 }
 0x414   :  { %v5679_v10 = vpop.eup %4314  ;;  %4328 = vpow2.f32 %v2907_v20  ;;  %v2724_v63 = vpop.xlane.xlu0 %2723  ;;  %v5881_v20 = vld [vmem:[#allocation8_spill] sm:$0xff] }
 0x415   :  { %v5681_v19 = vpop.eup %4316  ;;  %v2913_v3 = vmul.f32 1.442695, %v2800_v35  ;;  %v2801_v43 = vsub.f32 %v5878_v39, %v2724_v63  ;;  %3025 = vadd.xlane.f32.xlu1 %v5679_v10  ;;  %v5882_v63 = vld [vmem:[#allocation9_spill] sm:$0xff] }
 0x416   :  { %3023 = vadd.xlane.f32.xlu0 %v5681_v19  ;;  %v2726_v37 = vpop.xlane.xlu1 %2725 }
 0x417   :  { %4330 = vpow2.f32 %v2913_v3  ;;  %v2802_v7 = vsub.f32 %v5879_v21, %v2726_v37  ;;  %v2915_v45 = vmul.f32 1.442695, %v2801_v43  ;;  %v5883_v43 = vld [vmem:[#allocation10_spill] sm:$0xff] }
 0x418   :  { %v5687_v24 = vpop.eup %4318  ;;  %4332 = vpow2.f32 %v2911_v29  ;;  %v2728_v12 = vpop.xlane.xlu0 %2727 }
 0x419   :  { %v5689_v47 = vpop.eup %4320  ;;  %v2917_v51 = vmul.f32 1.442695, %v2802_v7  ;;  %v2803_v16 = vsub.f32 %v5880_v26, %v2728_v12  ;;  %3029 = vadd.xlane.f32.xlu1 %v5687_v24  ;;  %v5885_v26 = vld [vmem:[#allocation11_spill] sm:$0xff] }
 0x41a   :  { %3027 = vadd.xlane.f32.xlu0 %v5689_v47  ;;  %v2730_v23 = vpop.xlane.xlu1 %2729 }
 0x41b   :  { %4334 = vpow2.f32 %v2917_v51  ;;  %v2804_v55 = vsub.f32 %v5881_v20, %v2730_v23  ;;  %v2919_v32 = vmul.f32 1.442695, %v2803_v16  ;;  %v5886_v20 = vld [vmem:[#allocation12_spill] sm:$0xff] }
 0x41c   :  { %v5695_v59 = vpop.eup %4322  ;;  %4336 = vpow2.f32 %v2915_v45  ;;  %v2732_v25 = vpop.xlane.xlu0 %2731 }
 0x41d   :  { %v5697_v35 = vpop.eup %4324  ;;  %v2921_v29 = vmul.f32 1.442695, %v2804_v55  ;;  %v2805_v3 = vsub.f32 %v5882_v63, %v2732_v25  ;;  %3033 = vadd.xlane.f32.xlu1 %v5695_v59 }
 0x41e   :  { %3031 = vadd.xlane.f32.xlu0 %v5697_v35  ;;  %v2734_v39 = vpop.xlane.xlu1 %2733 }
 0x41f   :  { %4338 = vpow2.f32 %v2921_v29  ;;  %v2806_v37 = vsub.f32 %v5883_v43, %v2734_v39  ;;  %v2923_v7 = vmul.f32 1.442695, %v2805_v3  ;;  %v5889_v39 = vld [vmem:[#allocation13_spill] sm:$0xff] }
 0x420   :  { %v5703_v21 = vpop.eup %4326  ;;  %4340 = vpow2.f32 %v2919_v32  ;;  %v2736_v45 = vpop.xlane.xlu0 %2735 }
 0x421   :  { %v5705_v12 = vpop.eup %4328  ;;  %v2925_v51 = vmul.f32 1.442695, %v2806_v37  ;;  %v2807_v16 = vsub.f32 %v5885_v26, %v2736_v45  ;;  %3037 = vadd.xlane.f32.xlu1 %v5703_v21  ;;  %v5890_v45 = vld [vmem:[#allocation14_spill] sm:$0xff] }
 0x422   :  { %5884 = vst [vmem:[#allocation5_spill] sm:$0xff] %v5705_v12  ;;  %3035 = vadd.xlane.f32.xlu0 %v5705_v12  ;;  %v2738_v23 = vpop.xlane.xlu1 %2737  ;;  %v5892_v12 = vld [vmem:[#allocation15_spill] sm:$0xff] }
 0x423   :  { %4342 = vpow2.f32 %v2925_v51  ;;  %v2808_v55 = vsub.f32 %v5886_v20, %v2738_v23  ;;  %v2927_v29 = vmul.f32 1.442695, %v2807_v16 }
 0x424   :  { %v5711_v25 = vpop.eup %4330  ;;  %4344 = vpow2.f32 %v2923_v7  ;;  %v2740_v32 = vpop.xlane.xlu0 %2739 }
 0x425   :  { %5887 = vst [vmem:[#allocation6_spill] sm:$0xff] %v5711_v25  ;;  %v5713_v63 = vpop.eup %4332  ;;  %v2929_v3 = vmul.f32 1.442695, %v2808_v55  ;;  %v2809_v43 = vsub.f32 %v5889_v39, %v2740_v32  ;;  %3041 = vadd.xlane.f32.xlu1 %v5711_v25  ;;  %v5893_v39 = vld [vmem:[#allocation16_spill] sm:$0xff]  ;;  %v5894_v25 = vld [vmem:[#allocation17_spill] sm:$0xff] }
 0x426   :  { %5888 = vst [vmem:[#allocation7_spill] sm:$0xff] %v5713_v63  ;;  %3039 = vadd.xlane.f32.xlu0 %v5713_v63  ;;  %v2742_v37 = vpop.xlane.xlu1 %2741 }
 0x427   :  { %4346 = vpow2.f32 %v2929_v3  ;;  %v2810_v51 = vsub.f32 %v5890_v45, %v2742_v37  ;;  %v2931_v23 = vmul.f32 1.442695, %v2809_v43 }
 0x428   :  { %v5719_v26 = vpop.eup %4334  ;;  %4348 = vpow2.f32 %v2927_v29  ;;  %v2744_v7 = vpop.xlane.xlu0 %2743 }
 0x429   :  { %v5721_v16 = vpop.eup %4336  ;;  %v2933_v20 = vmul.f32 1.442695, %v2810_v51  ;;  %v2811_v55 = vsub.f32 %v5892_v12, %v2744_v7  ;;  %3045 = vadd.xlane.f32.xlu1 %v5719_v26  ;;  %v5895_v7 = vld [vmem:[#allocation18_spill] sm:$0xff] }
 0x42a   :  { %5891 = vst [vmem:[#allocation8_spill] sm:$0xff] %v5721_v16  ;;  %3043 = vadd.xlane.f32.xlu0 %v5721_v16  ;;  %v2746_v32 = vpop.xlane.xlu1 %2745 }
 0x42b   :  { %4350 = vpow2.f32 %v2933_v20  ;;  %v2812_v3 = vsub.f32 %v5893_v39, %v2746_v32  ;;  %v2935_v37 = vmul.f32 1.442695, %v2811_v55 }
 0x42c   :  { %v5727_v63 = vpop.eup %4338  ;;  %4352 = vpow2.f32 %v2931_v23  ;;  %v2748_v29 = vpop.xlane.xlu0 %2747 }
 0x42d   :  { %v5729_v43 = vpop.eup %4340  ;;  %v2937_v45 = vmul.f32 1.442695, %v2812_v3  ;;  %v2813_v51 = vsub.f32 %v5894_v25, %v2748_v29  ;;  %3049 = vadd.xlane.f32.xlu1 %v5727_v63 }
 0x42e   :  { %3047 = vadd.xlane.f32.xlu0 %v5729_v43  ;;  %v2750_v12 = vpop.xlane.xlu1 %2749 }
 0x42f   :  { %4354 = vpow2.f32 %v2937_v45  ;;  %v2814_v20 = vsub.f32 %v5895_v7, %v2750_v12  ;;  %v2939_v32 = vmul.f32 1.442695, %v2813_v51 }
 0x430   :  { %v5735_v16 = vpop.eup %4342  ;;  %4356 = vpow2.f32 %v2935_v37 }
 0x431   :  { %v5737_v23 = vpop.eup %4344  ;;  %v2941_v55 = vmul.f32 1.442695, %v2814_v20  ;;  %3053 = vadd.xlane.f32.xlu1 %v5735_v16 }
 0x432   :  { %3051 = vadd.xlane.f32.xlu0 %v5737_v23 }
 0x433   :  { %4358 = vpow2.f32 %v2941_v55 }
 0x434   :  { %v5741_v25 = vpop.eup %4346  ;;  %4360 = vpow2.f32 %v2939_v32 }
 0x435   :  { %5896 = vst [vmem:[#allocation9_spill] sm:$0xff] %v5741_v25  ;;  %v5743_v39 = vpop.eup %4348  ;;  %3057 = vadd.xlane.f32.xlu1 %v5741_v25 }
 0x436   :  { %5897 = vst [vmem:[#allocation10_spill] sm:$0xff] %v5743_v39  ;;  %3055 = vadd.xlane.f32.xlu0 %v5743_v39 }
 0x438   :  { %v5747_v3 = vpop.eup %4350 }
 0x439   :  { %5898 = vst [vmem:[#allocation11_spill] sm:$0xff] %v5747_v3  ;;  %v5749_v37 = vpop.eup %4352  ;;  %3061 = vadd.xlane.f32.xlu1 %v5747_v3 }
 0x43a   :  { %5899 = vst [vmem:[#allocation12_spill] sm:$0xff] %v5749_v37  ;;  %3059 = vadd.xlane.f32.xlu0 %v5749_v37 }
 0x43c   :  { %v5753_v29 = vpop.eup %4354 }
 0x43d   :  { %5900 = vst [vmem:[#allocation13_spill] sm:$0xff] %v5753_v29  ;;  %v5755_v45 = vpop.eup %4356  ;;  %3065 = vadd.xlane.f32.xlu1 %v5753_v29 }
 0x43e   :  { %5901 = vst [vmem:[#allocation14_spill] sm:$0xff] %v5755_v45  ;;  %3063 = vadd.xlane.f32.xlu0 %v5755_v45 }
 0x440   :  { %v5759_v51 = vpop.eup %4358 }
 0x441   :  { %5902 = vst [vmem:[#allocation15_spill] sm:$0xff] %v5759_v51  ;;  %v5761_v12 = vpop.eup %4360  ;;  %3069 = vadd.xlane.f32.xlu1 %v5759_v51 }
 0x442   :  { %5903 = vst [vmem:[#allocation16_spill] sm:$0xff] %v5761_v12  ;;  %3067 = vadd.xlane.f32.xlu0 %v5761_v12 }
 0x44a   :  { %v2946_v7 = vpop.xlane.xlu1 %2945 }
 0x44b   :  { %4362 = vrcp.f32 %v2946_v7 }
 0x44e   :  { %v2950_v20 = vpop.xlane.xlu1 %2949 }
 0x44f   :  { %4364 = vrcp.f32 %v2950_v20  ;;  %v2944_v32 = vpop.xlane.xlu0 %2943 }
 0x450   :  { %4366 = vrcp.f32 %v2944_v32 }
 0x453   :  { %v2948_v55 = vpop.xlane.xlu0 %2947 }
 0x454   :  { %4368 = vrcp.f32 %v2948_v55 }
 0x456   :  { %v2954_v37 = vpop.xlane.xlu1 %2953 }
 0x457   :  { %4370 = vrcp.f32 %v2954_v37  ;;  %v2952_v29 = vpop.xlane.xlu0 %2951 }
 0x458   :  { %v4363_v45 = vpop.eup %4362  ;;  %4372 = vrcp.f32 %v2952_v29 }
 0x459   :  { %v3074_v3 = vmul.f32 %v4363_v45, %v5517_v14 }
 0x45a   :  { %v2958_v39 = vpop.xlane.xlu1 %2957 }
 0x45b   :  { %3200 = vst [vmem:[#allocation2 + $0x8] sm:$0xff] %v3074_v3  ;;  %4374 = vrcp.f32 %v2958_v39  ;;  %v2956_v51 = vpop.xlane.xlu0 %2955 }
 0x45c   :  { %v4365_v12 = vpop.eup %4364  ;;  %4376 = vrcp.f32 %v2956_v51 }
 0x45d   :  { %v4367_v7 = vpop.eup %4366  ;;  %v3078_v20 = vmul.f32 %v4365_v12, %v5522_v1 }
 0x45e   :  { %v3072_v32 = vmul.f32 %v4367_v7, %v5524_v42  ;;  %v2962_v25 = vpop.xlane.xlu1 %2961 }
 0x45f   :  { %3202 = vst [vmem:[#allocation2 + $0x18] sm:$0xff] %v3078_v20  ;;  %4378 = vrcp.f32 %v2962_v25  ;;  %v2960_v37 = vpop.xlane.xlu0 %2959 }
 0x460   :  { %3199 = vst [vmem:[#allocation2] sm:$0xff] %v3072_v32  ;;  %4380 = vrcp.f32 %v2960_v37 }
 0x461   :  { %v4369_v29 = vpop.eup %4368 }
 0x462   :  { %v3076_v14 = vmul.f32 %v4369_v29, %v5530_v28  ;;  %v2966_v45 = vpop.xlane.xlu1 %2965 }
 0x463   :  { %4382 = vrcp.f32 %v2966_v45  ;;  %v2964_v39 = vpop.xlane.xlu0 %2963 }
 0x464   :  { %v4371_v3 = vpop.eup %4370  ;;  %3201 = vst [vmem:[#allocation2 + $0x10] sm:$0xff] %v3076_v14  ;;  %4384 = vrcp.f32 %v2964_v39 }
 0x465   :  { %v4373_v51 = vpop.eup %4372  ;;  %v3082_v1 = vmul.f32 %v4371_v3, %v5535_v30 }
 0x466   :  { %v3080_v42 = vmul.f32 %v4373_v51, %v5537_v50  ;;  %v2970_v12 = vpop.xlane.xlu1 %2969 }
 0x467   :  { %3204 = vst [vmem:[#allocation2 + $0x28] sm:$0xff] %v3082_v1  ;;  %4386 = vrcp.f32 %v2970_v12  ;;  %v2968_v25 = vpop.xlane.xlu0 %2967 }
 0x468   :  { %v4375_v55 = vpop.eup %4374  ;;  %3203 = vst [vmem:[#allocation2 + $0x20] sm:$0xff] %v3080_v42  ;;  %4388 = vrcp.f32 %v2968_v25 }
 0x469   :  { %v4377_v7 = vpop.eup %4376  ;;  %v3086_v28 = vmul.f32 %v4375_v55, %v5543_v36 }
 0x46a   :  { %v3084_v20 = vmul.f32 %v4377_v7, %v5545_v49  ;;  %v2974_v32 = vpop.xlane.xlu1 %2973 }
 0x46b   :  { %3206 = vst [vmem:[#allocation2 + $0x38] sm:$0xff] %v3086_v28  ;;  %4390 = vrcp.f32 %v2974_v32  ;;  %v2972_v37 = vpop.xlane.xlu0 %2971 }
 0x46c   :  { %v4379_v29 = vpop.eup %4378  ;;  %3205 = vst [vmem:[#allocation2 + $0x30] sm:$0xff] %v3084_v20  ;;  %4392 = vrcp.f32 %v2972_v37 }
 0x46d   :  { %v4381_v30 = vpop.eup %4380  ;;  %v3090_v50 = vmul.f32 %v4379_v29, %v5551_v17 }
 0x46e   :  { %v3088_v14 = vmul.f32 %v4381_v30, %v5553_v27  ;;  %v2978_v45 = vpop.xlane.xlu1 %2977 }
 0x46f   :  { %3208 = vst [vmem:[#allocation2 + $0x48] sm:$0xff] %v3090_v50  ;;  %4394 = vrcp.f32 %v2978_v45  ;;  %v2976_v39 = vpop.xlane.xlu0 %2975 }
 0x470   :  { %v4383_v3 = vpop.eup %4382  ;;  %3207 = vst [vmem:[#allocation2 + $0x40] sm:$0xff] %v3088_v14  ;;  %4396 = vrcp.f32 %v2976_v39 }
 0x471   :  { %v4385_v36 = vpop.eup %4384  ;;  %v3094_v49 = vmul.f32 %v4383_v3, %v5559_v9 }
 0x472   :  { %v3092_v51 = vmul.f32 %v4385_v36, %v5561_v48  ;;  %v2982_v1 = vpop.xlane.xlu1 %2981 }
 0x473   :  { %3210 = vst [vmem:[#allocation2 + $0x58] sm:$0xff] %v3094_v49  ;;  %4398 = vrcp.f32 %v2982_v1  ;;  %v2980_v42 = vpop.xlane.xlu0 %2979 }
 0x474   :  { %v4387_v12 = vpop.eup %4386  ;;  %3209 = vst [vmem:[#allocation2 + $0x50] sm:$0xff] %v3092_v51  ;;  %4400 = vrcp.f32 %v2980_v42 }
 0x475   :  { %v4389_v17 = vpop.eup %4388  ;;  %v3098_v27 = vmul.f32 %v4387_v12, %v5567_v53 }
 0x476   :  { %v3096_v25 = vmul.f32 %v4389_v17, %v5569_v33  ;;  %v2986_v55 = vpop.xlane.xlu1 %2985 }
 0x477   :  { %3212 = vst [vmem:[#allocation2 + $0x68] sm:$0xff] %v3098_v27  ;;  %4402 = vrcp.f32 %v2986_v55  ;;  %v2984_v7 = vpop.xlane.xlu0 %2983 }
 0x478   :  { %v4391_v28 = vpop.eup %4390  ;;  %3211 = vst [vmem:[#allocation2 + $0x60] sm:$0xff] %v3096_v25  ;;  %4404 = vrcp.f32 %v2984_v7 }
 0x479   :  { %v4393_v9 = vpop.eup %4392  ;;  %v3102_v48 = vmul.f32 %v4391_v28, %v5575_v57 }
 0x47a   :  { %v3100_v20 = vmul.f32 %v4393_v9, %v5577_v18  ;;  %v2990_v32 = vpop.xlane.xlu1 %2989 }
 0x47b   :  { %3214 = vst [vmem:[#allocation2 + $0x78] sm:$0xff] %v3102_v48  ;;  %4406 = vrcp.f32 %v2990_v32  ;;  %v2988_v37 = vpop.xlane.xlu0 %2987 }
 0x47c   :  { %v4395_v29 = vpop.eup %4394  ;;  %3213 = vst [vmem:[#allocation2 + $0x70] sm:$0xff] %v3100_v20  ;;  %4408 = vrcp.f32 %v2988_v37 }
 0x47d   :  { %v4397_v53 = vpop.eup %4396  ;;  %v3106_v33 = vmul.f32 %v4395_v29, %v5583_v22 }
 0x47e   :  { %v3104_v30 = vmul.f32 %v4397_v53, %v5585_v41  ;;  %v2994_v50 = vpop.xlane.xlu1 %2993 }
 0x47f   :  { %3216 = vst [vmem:[#allocation2 + $0x88] sm:$0xff] %v3106_v33  ;;  %4410 = vrcp.f32 %v2994_v50  ;;  %v2992_v14 = vpop.xlane.xlu0 %2991 }
 0x480   :  { %v4399_v45 = vpop.eup %4398  ;;  %3215 = vst [vmem:[#allocation2 + $0x80] sm:$0xff] %v3104_v30  ;;  %4412 = vrcp.f32 %v2992_v14 }
 0x481   :  { %v4401_v57 = vpop.eup %4400  ;;  %v3110_v18 = vmul.f32 %v4399_v45, %v5591_v61 }
 0x482   :  { %v3108_v39 = vmul.f32 %v4401_v57, %v5593_v34  ;;  %v2998_v3 = vpop.xlane.xlu1 %2997 }
 0x483   :  { %3218 = vst [vmem:[#allocation2 + $0x98] sm:$0xff] %v3110_v18  ;;  %4414 = vrcp.f32 %v2998_v3  ;;  %v2996_v36 = vpop.xlane.xlu0 %2995 }
 0x484   :  { %v4403_v49 = vpop.eup %4402  ;;  %3217 = vst [vmem:[#allocation2 + $0x90] sm:$0xff] %v3108_v39  ;;  %4416 = vrcp.f32 %v2996_v36 }
 0x485   :  { %v4405_v22 = vpop.eup %4404  ;;  %v3114_v41 = vmul.f32 %v4403_v49, %v5599_v38 }
 0x486   :  { %v3112_v51 = vmul.f32 %v4405_v22, %v5601_v40  ;;  %v3002_v1 = vpop.xlane.xlu1 %3001 }
 0x487   :  { %3220 = vst [vmem:[#allocation2 + $0xa8] sm:$0xff] %v3114_v41  ;;  %4418 = vrcp.f32 %v3002_v1  ;;  %v3000_v42 = vpop.xlane.xlu0 %2999 }
 0x488   :  { %v4407_v12 = vpop.eup %4406  ;;  %3219 = vst [vmem:[#allocation2 + $0xa0] sm:$0xff] %v3112_v51  ;;  %4420 = vrcp.f32 %v3000_v42 }
 0x489   :  { %v4409_v61 = vpop.eup %4408  ;;  %v3118_v34 = vmul.f32 %v4407_v12, %v5607_v44 }
 0x48a   :  { %v3116_v17 = vmul.f32 %v4409_v61, %v5609_v46  ;;  %v3006_v27 = vpop.xlane.xlu1 %3005 }
 0x48b   :  { %3222 = vst [vmem:[#allocation2 + $0xb8] sm:$0xff] %v3118_v34  ;;  %4422 = vrcp.f32 %v3006_v27  ;;  %v3004_v25 = vpop.xlane.xlu0 %3003 }
 0x48c   :  { %v4411_v55 = vpop.eup %4410  ;;  %3221 = vst [vmem:[#allocation2 + $0xb0] sm:$0xff] %v3116_v17  ;;  %4424 = vrcp.f32 %v3004_v25 }
 0x48d   :  { %v4413_v38 = vpop.eup %4412  ;;  %v3122_v40 = vmul.f32 %v4411_v55, %v5615_v31 }
 0x48e   :  { %v3120_v7 = vmul.f32 %v4413_v38, %v5617_v5  ;;  %v3010_v28 = vpop.xlane.xlu1 %3009 }
 0x48f   :  { %3224 = vst [vmem:[#allocation2 + $0xc8] sm:$0xff] %v3122_v40  ;;  %4426 = vrcp.f32 %v3010_v28  ;;  %v3008_v9 = vpop.xlane.xlu0 %3007 }
 0x490   :  { %v4415_v48 = vpop.eup %4414  ;;  %3223 = vst [vmem:[#allocation2 + $0xc0] sm:$0xff] %v3120_v7  ;;  %4428 = vrcp.f32 %v3008_v9 }
 0x491   :  { %v4417_v44 = vpop.eup %4416  ;;  %v3126_v46 = vmul.f32 %v4415_v48, %v5623_v52 }
 0x492   :  { %v3124_v20 = vmul.f32 %v4417_v44, %v5625_v54  ;;  %v3014_v32 = vpop.xlane.xlu1 %3013 }
 0x493   :  { %3226 = vst [vmem:[#allocation2 + $0xd8] sm:$0xff] %v3126_v46  ;;  %4430 = vrcp.f32 %v3014_v32  ;;  %v3012_v37 = vpop.xlane.xlu0 %3011 }
 0x494   :  { %v4419_v29 = vpop.eup %4418  ;;  %3225 = vst [vmem:[#allocation2 + $0xd0] sm:$0xff] %v3124_v20  ;;  %4432 = vrcp.f32 %v3012_v37 }
 0x495   :  { %v4421_v31 = vpop.eup %4420  ;;  %v3130_v5 = vmul.f32 %v4419_v29, %v5631_v56 }
 0x496   :  { %v3128_v53 = vmul.f32 %v4421_v31, %v5633_v58  ;;  %v3018_v33 = vpop.xlane.xlu1 %3017  ;;  %v5904_v31 = vld [vmem:[#allocation5_spill] sm:$0xff] }
 0x497   :  { %3228 = vst [vmem:[#allocation2 + $0xe8] sm:$0xff] %v3130_v5  ;;  %4434 = vrcp.f32 %v3018_v33  ;;  %v3016_v30 = vpop.xlane.xlu0 %3015 }
 0x498   :  { %v4423_v50 = vpop.eup %4422  ;;  %3227 = vst [vmem:[#allocation2 + $0xe0] sm:$0xff] %v3128_v53  ;;  %4436 = vrcp.f32 %v3016_v30 }
 0x499   :  { %v4425_v52 = vpop.eup %4424  ;;  %v3134_v54 = vmul.f32 %v4423_v50, %v5639_v60 }
 0x49a   :  { %v3132_v14 = vmul.f32 %v4425_v52, %v5641_v62  ;;  %v3022_v45 = vpop.xlane.xlu1 %3021  ;;  %v5906_v52 = vld [vmem:[#allocation7_spill] sm:$0xff] }
 0x49b   :  { %3230 = vst [vmem:[#allocation2 + $0xf8] sm:$0xff] %v3134_v54  ;;  %4438 = vrcp.f32 %v3022_v45  ;;  %v3020_v57 = vpop.xlane.xlu0 %3019 }
 0x49c   :  { %v4427_v18 = vpop.eup %4426  ;;  %3229 = vst [vmem:[#allocation2 + $0xf0] sm:$0xff] %v3132_v14  ;;  %4440 = vrcp.f32 %v3020_v57 }
 0x49d   :  { %v4429_v56 = vpop.eup %4428  ;;  %v3138_v58 = vmul.f32 %v4427_v18, %v5647_v0 }
 0x49e   :  { %v3136_v39 = vmul.f32 %v4429_v56, %v5649_v2  ;;  %v3026_v3 = vpop.xlane.xlu1 %3025  ;;  %v5907_v56 = vld [vmem:[#allocation8_spill] sm:$0xff] }
 0x49f   :  { %3232 = vst [vmem:[#allocation2 + $0x108] sm:$0xff] %v3138_v58  ;;  %4442 = vrcp.f32 %v3026_v3  ;;  %v3024_v36 = vpop.xlane.xlu0 %3023 }
 0x4a0   :  { %v4431_v49 = vpop.eup %4430  ;;  %3231 = vst [vmem:[#allocation2 + $0x100] sm:$0xff] %v3136_v39  ;;  %4444 = vrcp.f32 %v3024_v36 }
 0x4a1   :  { %v4433_v60 = vpop.eup %4432  ;;  %v3142_v62 = vmul.f32 %v4431_v49, %v5655_v4 }
 0x4a2   :  { %v3140_v22 = vmul.f32 %v4433_v60, %v5657_v6  ;;  %v3030_v41 = vpop.xlane.xlu1 %3029 }
 0x4a3   :  { %3234 = vst [vmem:[#allocation2 + $0x118] sm:$0xff] %v3142_v62  ;;  %4446 = vrcp.f32 %v3030_v41  ;;  %v3028_v51 = vpop.xlane.xlu0 %3027 }
 0x4a4   :  { %v4435_v1 = vpop.eup %4434  ;;  %3233 = vst [vmem:[#allocation2 + $0x110] sm:$0xff] %v3140_v22  ;;  %4448 = vrcp.f32 %v3028_v51 }
 0x4a5   :  { %v4437_v0 = vpop.eup %4436  ;;  %v3146_v2 = vmul.f32 %v4435_v1, %v5663_v8 }
 0x4a6   :  { %v3144_v42 = vmul.f32 %v4437_v0, %v5665_v11  ;;  %v3034_v12 = vpop.xlane.xlu1 %3033 }
 0x4a7   :  { %3236 = vst [vmem:[#allocation2 + $0x128] sm:$0xff] %v3146_v2  ;;  %4450 = vrcp.f32 %v3034_v12  ;;  %v3032_v61 = vpop.xlane.xlu0 %3031 }
 0x4a8   :  { %v4439_v34 = vpop.eup %4438  ;;  %3235 = vst [vmem:[#allocation2 + $0x120] sm:$0xff] %v3144_v42  ;;  %4452 = vrcp.f32 %v3032_v61 }
 0x4a9   :  { %v4441_v4 = vpop.eup %4440  ;;  %v3150_v6 = vmul.f32 %v4439_v34, %v5671_v13  ;;  %v5909_v34 = vld [vmem:[#allocation10_spill] sm:$0xff] }
 0x4aa   :  { %v3148_v17 = vmul.f32 %v4441_v4, %v5673_v15  ;;  %v3038_v27 = vpop.xlane.xlu1 %3037 }
 0x4ab   :  { %3238 = vst [vmem:[#allocation2 + $0x138] sm:$0xff] %v3150_v6  ;;  %4454 = vrcp.f32 %v3038_v27  ;;  %v3036_v25 = vpop.xlane.xlu0 %3035  ;;  %v5910_v27 = vld [vmem:[#allocation11_spill] sm:$0xff] }
 0x4ac   :  { %v4443_v55 = vpop.eup %4442  ;;  %3237 = vst [vmem:[#allocation2 + $0x130] sm:$0xff] %v3148_v17  ;;  %4456 = vrcp.f32 %v3036_v25  ;;  %v5911_v25 = vld [vmem:[#allocation12_spill] sm:$0xff] }
 0x4ad   :  { %v4445_v8 = vpop.eup %4444  ;;  %v3154_v11 = vmul.f32 %v4443_v55, %v5679_v10 }
 0x4ae   :  { %v3152_v38 = vmul.f32 %v4445_v8, %v5681_v19  ;;  %v3042_v40 = vpop.xlane.xlu1 %3041 }
 0x4af   :  { %3240 = vst [vmem:[#allocation2 + $0x148] sm:$0xff] %v3154_v11  ;;  %4458 = vrcp.f32 %v3042_v40  ;;  %v3040_v7 = vpop.xlane.xlu0 %3039  ;;  %v5912_v11 = vld [vmem:[#allocation13_spill] sm:$0xff]  ;;  %v5913_v40 = vld [vmem:[#allocation14_spill] sm:$0xff] }
 0x4b0   :  { %v4447_v28 = vpop.eup %4446  ;;  %3239 = vst [vmem:[#allocation2 + $0x140] sm:$0xff] %v3152_v38  ;;  %4460 = vrcp.f32 %v3040_v7 }
 0x4b1   :  { %v4449_v13 = vpop.eup %4448  ;;  %v3158_v15 = vmul.f32 %v4447_v28, %v5687_v24 }
 0x4b2   :  { %v3156_v9 = vmul.f32 %v4449_v13, %v5689_v47  ;;  %v3046_v48 = vpop.xlane.xlu1 %3045 }
 0x4b3   :  { %3242 = vst [vmem:[#allocation2 + $0x158] sm:$0xff] %v3158_v15  ;;  %4462 = vrcp.f32 %v3046_v48  ;;  %v3044_v44 = vpop.xlane.xlu0 %3043  ;;  %v5914_v15 = vld [vmem:[#allocation15_spill] sm:$0xff]  ;;  %v5915_v48 = vld [vmem:[#allocation16_spill] sm:$0xff] }
 0x4b4   :  { %v4451_v46 = vpop.eup %4450  ;;  %3241 = vst [vmem:[#allocation2 + $0x150] sm:$0xff] %v3156_v9  ;;  %4464 = vrcp.f32 %v3044_v44 }
 0x4b5   :  { %v4453_v10 = vpop.eup %4452  ;;  %v3162_v19 = vmul.f32 %v4451_v46, %v5695_v59 }
 0x4b6   :  { %v3160_v20 = vmul.f32 %v4453_v10, %v5697_v35  ;;  %v3050_v32 = vpop.xlane.xlu1 %3049  ;;  %v5905_v35 = vld [vmem:[#allocation6_spill] sm:$0xff] }
 0x4b7   :  { %3244 = vst [vmem:[#allocation2 + $0x168] sm:$0xff] %v3162_v19  ;;  %4466 = vrcp.f32 %v3050_v32  ;;  %v3048_v37 = vpop.xlane.xlu0 %3047 }
 0x4b8   :  { %v4455_v29 = vpop.eup %4454  ;;  %3243 = vst [vmem:[#allocation2 + $0x160] sm:$0xff] %v3160_v20  ;;  %4468 = vrcp.f32 %v3048_v37 }
 0x4b9   :  { %v4457_v24 = vpop.eup %4456  ;;  %v3166_v47 = vmul.f32 %v4455_v29, %v5703_v21 }
 0x4ba   :  { %v3164_v5 = vmul.f32 %v4457_v24, %v5904_v31  ;;  %v3054_v53 = vpop.xlane.xlu1 %3053 }
 0x4bb   :  { %3246 = vst [vmem:[#allocation2 + $0x178] sm:$0xff] %v3166_v47  ;;  %4470 = vrcp.f32 %v3054_v53  ;;  %v3052_v33 = vpop.xlane.xlu0 %3051 }
 0x4bc   :  { %v4459_v30 = vpop.eup %4458  ;;  %3245 = vst [vmem:[#allocation2 + $0x170] sm:$0xff] %v3164_v5  ;;  %4472 = vrcp.f32 %v3052_v33 }
 0x4bd   :  { %v4461_v59 = vpop.eup %4460  ;;  %v3170_v50 = vmul.f32 %v4459_v30, %v5905_v35 }
 0x4be   :  { %v3168_v54 = vmul.f32 %v4461_v59, %v5906_v52  ;;  %v3058_v14 = vpop.xlane.xlu1 %3057 }
 0x4bf   :  { %3248 = vst [vmem:[#allocation2 + $0x188] sm:$0xff] %v3170_v50  ;;  %4474 = vrcp.f32 %v3058_v14  ;;  %v3056_v45 = vpop.xlane.xlu0 %3055 }
 0x4c0   :  { %v4463_v57 = vpop.eup %4462  ;;  %3247 = vst [vmem:[#allocation2 + $0x180] sm:$0xff] %v3168_v54  ;;  %4476 = vrcp.f32 %v3056_v45 }
 0x4c1   :  { %v4465_v21 = vpop.eup %4464  ;;  %v3174_v18 = vmul.f32 %v4463_v57, %v5719_v26 }
 0x4c2   :  { %v3172_v58 = vmul.f32 %v4465_v21, %v5907_v56  ;;  %v3062_v39 = vpop.xlane.xlu1 %3061 }
 0x4c3   :  { %3250 = vst [vmem:[#allocation2 + $0x198] sm:$0xff] %v3174_v18  ;;  %4478 = vrcp.f32 %v3062_v39  ;;  %v3060_v3 = vpop.xlane.xlu0 %3059 }
 0x4c4   :  { %v4467_v36 = vpop.eup %4466  ;;  %3249 = vst [vmem:[#allocation2 + $0x190] sm:$0xff] %v3172_v58  ;;  %4480 = vrcp.f32 %v3060_v3 }
 0x4c5   :  { %v4469_v49 = vpop.eup %4468  ;;  %v3178_v60 = vmul.f32 %v4467_v36, %v5727_v63 }
 0x4c6   :  { %v3176_v62 = vmul.f32 %v4469_v49, %v5729_v43  ;;  %v3066_v22 = vpop.xlane.xlu1 %3065  ;;  %v5908_v43 = vld [vmem:[#allocation9_spill] sm:$0xff] }
 0x4c7   :  { %3252 = vst [vmem:[#allocation2 + $0x1a8] sm:$0xff] %v3178_v60  ;;  %4482 = vrcp.f32 %v3066_v22  ;;  %v3064_v41 = vpop.xlane.xlu0 %3063 }
 0x4c8   :  { %v4471_v51 = vpop.eup %4470  ;;  %3251 = vst [vmem:[#allocation2 + $0x1a0] sm:$0xff] %v3176_v62  ;;  %4484 = vrcp.f32 %v3064_v41 }
 0x4c9   :  { %v4473_v26 = vpop.eup %4472  ;;  %v3182_v1 = vmul.f32 %v4471_v51, %v5735_v16 }
 0x4ca   :  { %v3180_v0 = vmul.f32 %v4473_v26, %v5737_v23  ;;  %v3070_v2 = vpop.xlane.xlu1 %3069 }
 0x4cb   :  { %3254 = vst [vmem:[#allocation2 + $0x1b8] sm:$0xff] %v3182_v1  ;;  %4486 = vrcp.f32 %v3070_v2  ;;  %v3068_v42 = vpop.xlane.xlu0 %3067 }
 0x4cc   :  { %v4475_v12 = vpop.eup %4474  ;;  %3253 = vst [vmem:[#allocation2 + $0x1b0] sm:$0xff] %v3180_v0  ;;  %4488 = vrcp.f32 %v3068_v42 }
 0x4cd   :  { %v4477_v63 = vpop.eup %4476  ;;  %v3186_v61 = vmul.f32 %v4475_v12, %v5908_v43 }
 0x4ce   :  { %v3184_v4 = vmul.f32 %v4477_v63, %v5909_v34 }
 0x4cf   :  { %3256 = vst [vmem:[#allocation2 + $0x1c8] sm:$0xff] %v3186_v61 }
 0x4d0   :  { %v4479_v6 = vpop.eup %4478  ;;  %3255 = vst [vmem:[#allocation2 + $0x1c0] sm:$0xff] %v3184_v4 }
 0x4d1   :  { %v4481_v17 = vpop.eup %4480  ;;  %v3190_v16 = vmul.f32 %v4479_v6, %v5910_v27 }
 0x4d2   :  { %v3188_v23 = vmul.f32 %v4481_v17, %v5911_v25 }
 0x4d3   :  { %3258 = vst [vmem:[#allocation2 + $0x1d8] sm:$0xff] %v3190_v16 }
 0x4d4   :  { %v4483_v55 = vpop.eup %4482  ;;  %3257 = vst [vmem:[#allocation2 + $0x1d0] sm:$0xff] %v3188_v23 }
 0x4d5   :  { %v4485_v8 = vpop.eup %4484  ;;  %v3194_v38 = vmul.f32 %v4483_v55, %v5912_v11 }
 0x4d6   :  { %v3192_v7 = vmul.f32 %v4485_v8, %v5913_v40 }
 0x4d7   :  { %3260 = vst [vmem:[#allocation2 + $0x1e8] sm:$0xff] %v3194_v38 }
 0x4d8   :  { %v4487_v28 = vpop.eup %4486  ;;  %3259 = vst [vmem:[#allocation2 + $0x1e0] sm:$0xff] %v3192_v7 }
 0x4d9   :  { %v4489_v13 = vpop.eup %4488  ;;  %v3198_v9 = vmul.f32 %v4487_v28, %v5914_v15 }
 0x4da   :  { %v3196_v44 = vmul.f32 %v4489_v13, %v5915_v48 }
 0x4db   :  { %3262 = vst [vmem:[#allocation2 + $0x1f8] sm:$0xff] %v3198_v9 }
 0x4dc   :  { %3261 = vst [vmem:[#allocation2 + $0x1f0] sm:$0xff] %v3196_v44 }
 0x4dd   :  { %4501 = shalt.err (!%p4498_p4)
}
 0x4de   :  { %s4513_s29 = smov 128   ;;  %s4514_s30 = smov 8  }
 0x4df   :  { %3274 = dma.vmem_to_hbm [thread:$0]  %s3269_s27, 8192, %s5837_s5, [#allocation3], %s4513_s29, %s4513_s29, %s4514_s30  }
 0x4e0   :  { %4510 = dma.done.wait [#allocation3], 8192  }
 0x4e1   :  { %4511 = vsyncadd [#allocation3], 4294959104 }
 0x4e2   :  { %3278 = vsyncpa [#allocation3], 1 }

</bundles_post_ra>
